<compile_context>
chip_gen: v6e
topology: v6e:2x2x1
jax: 0.10.0
libtpu: 0.0.40
codegen_flags: <defaults>
</compile_context>

<pallas_src>
import numpy as np
import jax
import jax.numpy as jnp
from jax.experimental import pallas as pl
from jax.experimental.pallas import tpu as pltpu


def make_wavenet_kernel(dilations, G, GC, GS, scale):
    """GC = G*res_channels (t/s packed width), GS = G*skip_channels."""
    dilations = tuple(int(d) for d in dilations)

    def kernel(x_ref, caus_ref, dilw_ref, rsw_ref, resb_ref, skipb_ref,
               d1w_ref, d1b_ref, ea_ref, eb_ref, out_ref):
        f32 = jnp.float32
        bf16 = jnp.bfloat16

        def mm(a, w):  # bf16 MXU inputs, f32 accumulation
            return jnp.dot(a.astype(bf16), w, preferred_element_type=f32)

        x = x_ref[...]                                   # [R, G*Cin] f32
        R = x.shape[0]

        # Causal conv (k=2): in-row taps folded into caus[0]; cross-row tap via roll-by-1.
        h = mm(x, caus_ref[0]) + mm(pltpu.roll(x, 1, axis=0), caus_ref[1])   # [R, GC]

        skip_acc = jnp.zeros((R, GS), f32)
        # NOTE: static unroll is fine for this 6-block config; use lax.fori_loop with an
        # SMEM dilation table for production stack/layer counts to bound live ranges.
        for blk, d in enumerate(dilations):
            q, rmd = divmod(d, G)
            pre = mm(h, dilw_ref[blk, 0])                               # shift-0 (t|s fused)
            if q > 0:
                pre = pre + mm(pltpu.roll(h, q, axis=0), dilw_ref[blk, 2])
            if rmd > 0:
                pre = pre + mm(pltpu.roll(h, q + 1, axis=0), dilw_ref[blk, 1])
            gated = jnp.tanh(pre[:, :GC]) * jax.nn.sigmoid(pre[:, GC:])  # [R, GC]
            rs = mm(gated, rsw_ref[blk])                                 # [R, GC+GS] = [res|skip]
            h = rs[:, :GC] + resb_ref[blk] + h
            skip_acc = skip_acc + rs[:, GC:]

        # DensNet head (skip biases pre-summed in the wrapper; relu -> 1x1 -> relu -> conv2 taps).
        y = jnp.maximum(skip_acc + skipb_ref[...], 0.0)
        y = jnp.maximum(mm(y, d1w_ref[...]) + d1b_ref[...], 0.0)
        out = mm(y, ea_ref[...])                                         # in-row conv2 taps
        if scale > 1:
            out = out + mm(pltpu.roll(y, R - 1, axis=0), eb_ref[...])    # cross-row taps
        out_ref[...] = out.astype(out_ref.dtype)

    return kernel


def pack_wavenet_weights(p, dilations, scale, G):
    """Pre-pack weights into lane-dense block-structured matrices (wrapper-side, once)."""
    f = np.float32
    cw = np.asarray(p["causal_w"], f)          # [2, Cin, Cres]: tap x[t-1], tap x[t]
    dil = np.asarray(p["dil_w"], f)            # [nb, 4, Cres, Cres]: t0, t1, s0, s1
    res_w = np.asarray(p["res_w"], f)          # [nb, Cres, Cres]
    skip_w = np.asarray(p["skip_w"], f)        # [nb, Cres, Cskip]
    res_b = np.asarray(p["res_b"], f)          # [nb, 1, Cres]
    skip_b = np.asarray(p["skip_b"], f)        # [nb, 1, Cskip]
    d1_w = np.asarray(p["d1_w"], f)            # [Cskip, Cskip]
    d1_b = np.asarray(p["d1_b"], f)            # [1, Cskip]
    d2_w = np.asarray(p["d2_w"], f)            # [scale, Cskip, Cout]

    Cin, Cres = cw.shape[1], cw.shape[2]
    Cskip, Cout = skip_w.shape[2], d2_w.shape[2]
    nb = len(dilations)
    GC = G * Cres

    # Causal conv: slot 0 applied to x, slot 1 applied to roll(x, 1).
    caus = np.zeros((2, G * Cin, GC), f)
    for g in range(G):
        caus[0, g * Cin:(g + 1) * Cin, g * Cres:(g + 1) * Cres] = cw[1]
        if g >= 1:
            caus[0, (g - 1) * Cin:g * Cin, g * Cres:(g + 1) * Cres] = cw[0]
        else:
            caus[1, (G - 1) * Cin:G * Cin, g * Cres:(g + 1) * Cres] = cw[0]

    # Dilated convs: slot0 -> h, slot1 -> roll(h, q+1), slot2 (if any d >= G) -> roll(h, q).
    # Output layout: columns [0:GC) = tanh branch, [GC:2GC) = sigmoid branch.
    n_slots = 3 if any(int(d) // G > 0 for d in dilations) else 2
    dilw = np.zeros((nb, n_slots, GC, 2 * GC), f)
    for b, d in enumerate(dilations):
        q, rmd = divmod(int(d), G)
        Wt0, Wt1, Ws0, Ws1 = dil[b, 0], dil[b, 1], dil[b, 2], dil[b, 3]
        for g in range(G):
            dilw[b, 0, g * Cres:(g + 1) * Cres, g * Cres:(g + 1) * Cres] += Wt1
            dilw[b, 0, g * Cres:(g + 1) * Cres, GC + g * Cres:GC + (g + 1) * Cres] += Ws1
            if g >= rmd:
                gi, slot = g - rmd, (0 if q == 0 else 2)
            else:
                gi, slot = g - rmd + G, 1
            dilw[b, slot, gi * Cres:(gi + 1) * Cres, g * Cres:(g + 1) * Cres] += Wt0
            dilw[b, slot, gi * Cres:(gi + 1) * Cres, GC + g * Cres:GC + (g + 1) * Cres] += Ws0

    # Fused 1x1 residual/skip convs: columns [0:GC) = res, [GC:GC+G*Cskip) = skip.
    rs = np.zeros((nb, GC, GC + G * Cskip), f)
    for b in range(nb):
        for g in range(G):
            rs[b, g * Cres:(g + 1) * Cres, g * Cres:(g + 1) * Cres] = res_w[b]
            rs[b, g * Cres:(g + 1) * Cres, GC + g * Cskip:GC + (g + 1) * Cskip] = skip_w[b]

    resb = np.tile(res_b, (1, 1, G))                      # [nb, 1, GC]
    skipb = np.tile(skip_b.sum(axis=0), (1, G))           # [1, G*Cskip] (biases pre-summed)

    d1 = np.zeros((G * Cskip, G * Cskip), f)
    for g in range(G):
        d1[g * Cskip:(g + 1) * Cskip, g * Cskip:(g + 1) * Cskip] = d1_w
    d1b = np.tile(d1_b, (1, G))                           # [1, G*Cskip]

    # DensNet conv2 (kernel == stride == scale): tap k at time t+k folded into weights;
    # EA handles in-row taps, EB the cross-row carry applied to roll(y, -1).
    ea = np.zeros((G * Cskip, G * Cout), f)
    eb = np.zeros((G * Cskip, G * Cout), f)
    for k in range(scale):
        for g in range(G):
            gi = g + k
            tgt = ea if gi < G else eb
            gi = gi % G
            tgt[gi * Cskip:(gi + 1) * Cskip, g * Cout:(g + 1) * Cout] += d2_w[k]

    bf = jnp.bfloat16
    return dict(
        caus=jnp.asarray(caus, bf), dil=jnp.asarray(dilw, bf), rs=jnp.asarray(rs, bf),
        resb=jnp.asarray(resb), skipb=jnp.asarray(skipb),
        d1=jnp.asarray(d1, bf), d1b=jnp.asarray(d1b),
        ea=jnp.asarray(ea, bf), eb=jnp.asarray(eb, bf))


def wavenet_forward(x, p, *, dilations, scale):
    B, T, Cin = x.shape
    receptive = int(sum(dilations))
    skip_size = T - receptive
    assert skip_size >= 1, "timestep must exceed receptive field"
    t_out = skip_size // scale
    assert t_out >= 1
    Cres = p["causal_w"].shape[-1]
    Cskip = p["skip_w"].shape[-1]
    Cout = p["d2_w"].shape[-1]
    assert 128 % Cres == 0, "res_channels must divide 128"  # TODO(synk): pad Cres otherwise
    G = 128 // Cres
    assert 1 <= scale <= G
    assert all(int(d) >= 1 for d in dilations)

    # Per-sequence LEFT pad: T_pad a multiple of 8*G (clean sublane/lane packing) and
    # pad >= G so that roll-wraparound junk (bounded by receptive + G - 1 rows) can never
    # reach the first selected output row at pad + receptive.
    T_pad = ((T + G + 8 * G - 1) // (8 * G)) * (8 * G)
    pad = T_pad - T
    assert pad >= G >= 1
    R = T_pad // G

    xp = jnp.pad(x.astype(jnp.float32), ((0, 0), (pad, 0), (0, 0)))   # [B, T_pad, Cin]
    x_packed = xp.reshape(B, R, G * Cin)                              # time-major lane packing

    w = pack_wavenet_weights(p, dilations, scale, G)
    kernel = make_wavenet_kernel(dilations, G, G * Cres, G * Cskip, scale)

    def full_spec(arr):
        nd = arr.ndim
        return pl.BlockSpec(arr.shape, lambda b, nd=nd: (0,) * nd)

    weights = [w["caus"], w["dil"], w["rs"], w["resb"], w["skipb"],
               w["d1"], w["d1b"], w["ea"], w["eb"]]
    in_specs = ([pl.BlockSpec((None, R, G * Cin), lambda b: (b, 0, 0))]
                + [full_spec(a) for a in weights])
    out_spec = pl.BlockSpec((None, R, G * Cout), lambda b: (b, 0, 0))

    out = pl.pallas_call(
        kernel,
        grid=(B,),
        in_specs=in_specs,
        out_specs=out_spec,
        out_shape=jax.ShapeDtypeStruct((B, R, G * Cout), jnp.float32),
        compiler_params=pltpu.CompilerParams(
            dimension_semantics=("parallel",),
            # Re-derive per generation: physical VMEM is 128 MiB (v5e/v6e) / 64 MiB (v7x).
            vmem_limit_bytes=32 * 1024 * 1024),
    )(x_packed, *weights)

    # Tiny epilogue (per perf review): strided output-row selection + conv2 bias + exact
    # softmax on the selected [B, t_out, Cout] slab.
    q_full = out.reshape(B, T_pad, Cout)
    w0 = pad + receptive
    logits = q_full[:, w0:w0 + t_out * scale:scale, :] + p["d2_b"]
    return jax.nn.softmax(logits, axis=-1)                            # [B, t_out, Cout]


def init_params(key, *, in_ch, res_ch, out_ch, n_blk, scale):
    ks = jax.random.split(key, 10)
    s = 0.1
    n = lambda k, shape: jax.random.normal(k, shape, jnp.float32) * s
    return {
        "causal_w": n(ks[0], (2, in_ch, res_ch)),        # kernel-size-2 causal conv (no bias)
        "dil_w":   n(ks[1], (n_blk, 4, res_ch, res_ch)), # per block: [t0, t1, s0, s1] (no bias)
        "res_w":   n(ks[2], (n_blk, res_ch, res_ch)),
        "res_b":   n(ks[3], (n_blk, 1, res_ch)),
        "skip_w":  n(ks[4], (n_blk, res_ch, in_ch)),     # skip_channels == in_channels
        "skip_b":  n(ks[5], (n_blk, 1, in_ch)),
        "d1_w":    n(ks[6], (in_ch, in_ch)),
        "d1_b":    n(ks[7], (1, in_ch)),
        "d2_w":    n(ks[8], (scale, in_ch, out_ch)),     # kernel=stride=input_scale conv taps
        "d2_b":    n(ks[9], (1, out_ch)),
    }


def ref_forward(x, p, dilations, scale):
    """Pure-JAX reference (same math, unpacked) used for a correctness check."""
    B, T, Cin = x.shape
    skip_size = T - sum(dilations)
    t_out = skip_size // scale
    xp = jnp.concatenate([jnp.zeros((B, 1, Cin), x.dtype), x], axis=1)
    h = xp[:, :T] @ p["causal_w"][0] + xp[:, 1:] @ p["causal_w"][1]
    skip_sum = jnp.zeros((B, skip_size, p["skip_b"].shape[-1]), jnp.float32)
    for blk, d in enumerate(dilations):
        L = h.shape[1]
        lo, hi = h[:, :L - d], h[:, d:]
        out_t = lo @ p["dil_w"][blk, 0] + hi @ p["dil_w"][blk, 1]
        out_s = lo @ p["dil_w"][blk, 2] + hi @ p["dil_w"][blk, 3]
        gated = jnp.tanh(out_t) * jax.nn.sigmoid(out_s)
        h = gated @ p["res_w"][blk] + p["res_b"][blk] + hi
        skip = gated[:, gated.shape[1] - skip_size:] @ p["skip_w"][blk] + p["skip_b"][blk]
        skip_sum = skip_sum + skip
    y = jnp.maximum(skip_sum, 0.0)
    y = jnp.maximum(y @ p["d1_w"] + p["d1_b"], 0.0)
    acc = jnp.zeros((B, t_out, p["d2_b"].shape[-1]), jnp.float32) + p["d2_b"]
    for k in range(scale):
        acc = acc + y[:, k::scale][:, :t_out] @ p["d2_w"][k]
    return jax.nn.softmax(acc, axis=-1)


if __name__ == "__main__":
    # WaveNetModule(layer_size=3, stack_size=2, in_channels=4, res_channels=8,
    #               out_channels=4, gc_channels=0, input_scale=2, preconv='none')
    LAYER_SIZE, STACK_SIZE = 3, 2
    IN_CH, RES_CH, OUT_CH = 4, 8, 4
    INPUT_SCALE = 2
    B, T = 2, 30
    dilations = [2 ** l for _ in range(STACK_SIZE) for l in range(LAYER_SIZE)]  # receptive = 14

    key = jax.random.PRNGKey(0)
    kx, kp = jax.random.split(key)
    x = jax.random.normal(kx, (B, T, IN_CH), jnp.float32)   # [batch, timestep, channels]
    params = init_params(kp, in_ch=IN_CH, res_ch=RES_CH, out_ch=OUT_CH,
                         n_blk=len(dilations), scale=INPUT_SCALE)

    out = wavenet_forward(x, params, dilations=dilations, scale=INPUT_SCALE)
    out = jax.block_until_ready(out)                         # [B, T_out, OUT_CH] = [2, 8, 4]

    ref = ref_forward(x, params, dilations, INPUT_SCALE)
    np.testing.assert_allclose(np.asarray(out), np.asarray(ref), rtol=5e-2, atol=2e-2)
    print("KERNEL_OK")
</pallas_src>

<mosaic_0001>
module attributes {stable_mosaic.version = 11 : i64} {
  func.func @kernel(%arg0: i32, %arg1: memref<1x8x64xf32, #tpu.memory_space<vmem>>, %arg2: memref<2x64x128xbf16, #tpu.memory_space<vmem>>, %arg3: memref<6x2x128x256xbf16, #tpu.memory_space<vmem>>, %arg4: memref<6x128x192xbf16, #tpu.memory_space<vmem>>, %arg5: memref<6x1x128xf32, #tpu.memory_space<vmem>>, %arg6: memref<1x64xf32, #tpu.memory_space<vmem>>, %arg7: memref<64x64xbf16, #tpu.memory_space<vmem>>, %arg8: memref<1x64xf32, #tpu.memory_space<vmem>>, %arg9: memref<64x64xbf16, #tpu.memory_space<vmem>>, %arg10: memref<64x64xbf16, #tpu.memory_space<vmem>>, %arg11: memref<1x8x64xf32, #tpu.memory_space<vmem>>) attributes {dimension_semantics = [#tpu.dimension_semantics<parallel>], iteration_bounds = array<i64: 2>, scalar_prefetch = 0 : i64, scratch_operands = 0 : i64, tpu.core_type = #tpu.core_type<tc>, window_params = [{transform_indices = @transform_0, window_bounds = array<i64: 1, 8, 64>}, {pipeline_mode = #tpu.pipeline_mode<synchronous>, transform_indices = @transform_1, window_bounds = array<i64: 2, 64, 128>}, {pipeline_mode = #tpu.pipeline_mode<synchronous>, transform_indices = @transform_2, window_bounds = array<i64: 6, 2, 128, 256>}, {pipeline_mode = #tpu.pipeline_mode<synchronous>, transform_indices = @transform_3, window_bounds = array<i64: 6, 128, 192>}, {pipeline_mode = #tpu.pipeline_mode<synchronous>, transform_indices = @transform_4, window_bounds = array<i64: 6, 1, 128>}, {pipeline_mode = #tpu.pipeline_mode<synchronous>, transform_indices = @transform_5, window_bounds = array<i64: 1, 64>}, {pipeline_mode = #tpu.pipeline_mode<synchronous>, transform_indices = @transform_6, window_bounds = array<i64: 64, 64>}, {pipeline_mode = #tpu.pipeline_mode<synchronous>, transform_indices = @transform_7, window_bounds = array<i64: 1, 64>}, {pipeline_mode = #tpu.pipeline_mode<synchronous>, transform_indices = @transform_8, window_bounds = array<i64: 64, 64>}, {pipeline_mode = #tpu.pipeline_mode<synchronous>, transform_indices = @transform_9, window_bounds = array<i64: 64, 64>}, {transform_indices = @transform_10, window_bounds = array<i64: 1, 8, 64>}]} {
    %c0 = arith.constant 0 : index
    %c0_0 = arith.constant 0 : index
    %c0_1 = arith.constant 0 : index
    %0 = vector.load %arg1[%c0, %c0_0, %c0_1] : memref<1x8x64xf32, #tpu.memory_space<vmem>>, vector<1x8x64xf32>
    %1 = vector.shape_cast %0 : vector<1x8x64xf32> to vector<8x64xf32>
    %c0_2 = arith.constant 0 : index
    %c0_3 = arith.constant 0 : index
    %c0_4 = arith.constant 0 : index
    %2 = vector.load %arg2[%c0_2, %c0_3, %c0_4] : memref<2x64x128xbf16, #tpu.memory_space<vmem>>, vector<1x64x128xbf16>
    %3 = vector.shape_cast %2 : vector<1x64x128xbf16> to vector<64x128xbf16>
    %4 = arith.truncf %1 : vector<8x64xf32> to vector<8x64xbf16>
    %cst = arith.constant dense<0.000000e+00> : vector<8x128xf32>
    %5 = tpu.matmul %4, %3, %cst {dimension_numbers = #tpu.dot_dimension_numbers<[1], [0], [0], [1], [0, 0, 1, 1], [], []>} : vector<8x64xbf16>, vector<64x128xbf16>, vector<8x128xf32> -> vector<8x128xf32>
    %c1_i32 = arith.constant 1 : i32
    %6 = tpu.dynamic_rotate %1 by %c1_i32 dim 0 : vector<8x64xf32>, i32 -> vector<8x64xf32>
    %c1 = arith.constant 1 : index
    %c0_5 = arith.constant 0 : index
    %c0_6 = arith.constant 0 : index
    %7 = vector.load %arg2[%c1, %c0_5, %c0_6] : memref<2x64x128xbf16, #tpu.memory_space<vmem>>, vector<1x64x128xbf16>
    %8 = vector.shape_cast %7 : vector<1x64x128xbf16> to vector<64x128xbf16>
    %9 = arith.truncf %6 : vector<8x64xf32> to vector<8x64xbf16>
    %cst_7 = arith.constant dense<0.000000e+00> : vector<8x128xf32>
    %10 = tpu.matmul %9, %8, %cst_7 {dimension_numbers = #tpu.dot_dimension_numbers<[1], [0], [0], [1], [0, 0, 1, 1], [], []>} : vector<8x64xbf16>, vector<64x128xbf16>, vector<8x128xf32> -> vector<8x128xf32>
    %11 = arith.addf %5, %10 : vector<8x128xf32>
    %cst_8 = arith.constant 0.000000e+00 : f32
    %12 = vector.broadcast %cst_8 : f32 to vector<8x64xf32>
    %c0_9 = arith.constant 0 : index
    %c0_10 = arith.constant 0 : index
    %c0_11 = arith.constant 0 : index
    %c0_12 = arith.constant 0 : index
    %13 = vector.load %arg3[%c0_9, %c0_10, %c0_11, %c0_12] : memref<6x2x128x256xbf16, #tpu.memory_space<vmem>>, vector<1x1x128x256xbf16>
    %14 = vector.shape_cast %13 : vector<1x1x128x256xbf16> to vector<128x256xbf16>
    %15 = arith.truncf %11 : vector<8x128xf32> to vector<8x128xbf16>
    %cst_13 = arith.constant dense<0.000000e+00> : vector<8x256xf32>
    %16 = tpu.matmul %15, %14, %cst_13 {dimension_numbers = #tpu.dot_dimension_numbers<[1], [0], [0], [1], [0, 0, 1, 1], [], []>} : vector<8x128xbf16>, vector<128x256xbf16>, vector<8x256xf32> -> vector<8x256xf32>
    %c1_i32_14 = arith.constant 1 : i32
    %17 = tpu.dynamic_rotate %11 by %c1_i32_14 dim 0 : vector<8x128xf32>, i32 -> vector<8x128xf32>
    %c0_15 = arith.constant 0 : index
    %c1_16 = arith.constant 1 : index
    %c0_17 = arith.constant 0 : index
    %c0_18 = arith.constant 0 : index
    %18 = vector.load %arg3[%c0_15, %c1_16, %c0_17, %c0_18] : memref<6x2x128x256xbf16, #tpu.memory_space<vmem>>, vector<1x1x128x256xbf16>
    %19 = vector.shape_cast %18 : vector<1x1x128x256xbf16> to vector<128x256xbf16>
    %20 = arith.truncf %17 : vector<8x128xf32> to vector<8x128xbf16>
    %cst_19 = arith.constant dense<0.000000e+00> : vector<8x256xf32>
    %21 = tpu.matmul %20, %19, %cst_19 {dimension_numbers = #tpu.dot_dimension_numbers<[1], [0], [0], [1], [0, 0, 1, 1], [], []>} : vector<8x128xbf16>, vector<128x256xbf16>, vector<8x256xf32> -> vector<8x256xf32>
    %22 = arith.addf %16, %21 : vector<8x256xf32>
    %23 = vector.extract_strided_slice %22 {offsets = [0, 0], sizes = [8, 128], strides = [1, 1]} : vector<8x256xf32> to vector<8x128xf32>
    %24 = math.tanh %23 : vector<8x128xf32>
    %25 = vector.extract_strided_slice %22 {offsets = [0, 128], sizes = [8, 128], strides = [1, 1]} : vector<8x256xf32> to vector<8x128xf32>
    %26 = arith.negf %25 : vector<8x128xf32>
    %27 = math.exp %26 : vector<8x128xf32>
    %cst_20 = arith.constant 1.000000e+00 : f32
    %28 = vector.broadcast %cst_20 : f32 to vector<8x128xf32>
    %29 = arith.addf %28, %27 : vector<8x128xf32>
    %30 = arith.divf %28, %29 : vector<8x128xf32>
    %31 = arith.mulf %24, %30 : vector<8x128xf32>
    %c0_21 = arith.constant 0 : index
    %c0_22 = arith.constant 0 : index
    %c0_23 = arith.constant 0 : index
    %32 = vector.load %arg4[%c0_21, %c0_22, %c0_23] : memref<6x128x192xbf16, #tpu.memory_space<vmem>>, vector<1x128x192xbf16>
    %33 = vector.shape_cast %32 : vector<1x128x192xbf16> to vector<128x192xbf16>
    %34 = arith.truncf %31 : vector<8x128xf32> to vector<8x128xbf16>
    %cst_24 = arith.constant dense<0.000000e+00> : vector<8x192xf32>
    %35 = tpu.matmul %34, %33, %cst_24 {dimension_numbers = #tpu.dot_dimension_numbers<[1], [0], [0], [1], [0, 0, 1, 1], [], []>} : vector<8x128xbf16>, vector<128x192xbf16>, vector<8x192xf32> -> vector<8x192xf32>
    %36 = vector.extract_strided_slice %35 {offsets = [0, 0], sizes = [8, 128], strides = [1, 1]} : vector<8x192xf32> to vector<8x128xf32>
    %c0_25 = arith.constant 0 : index
    %c0_26 = arith.constant 0 : index
    %c0_27 = arith.constant 0 : index
    %37 = vector.load %arg5[%c0_25, %c0_26, %c0_27] : memref<6x1x128xf32, #tpu.memory_space<vmem>>, vector<1x1x128xf32>
    %38 = vector.shape_cast %37 : vector<1x1x128xf32> to vector<1x128xf32>
    %39 = vector.broadcast %38 : vector<1x128xf32> to vector<8x128xf32>
    %40 = arith.addf %36, %39 : vector<8x128xf32>
    %41 = arith.addf %40, %11 : vector<8x128xf32>
    %42 = vector.extract_strided_slice %35 {offsets = [0, 128], sizes = [8, 64], strides = [1, 1]} : vector<8x192xf32> to vector<8x64xf32>
    %43 = arith.addf %12, %42 : vector<8x64xf32>
    %c1_28 = arith.constant 1 : index
    %c0_29 = arith.constant 0 : index
    %c0_30 = arith.constant 0 : index
    %c0_31 = arith.constant 0 : index
    %44 = vector.load %arg3[%c1_28, %c0_29, %c0_30, %c0_31] : memref<6x2x128x256xbf16, #tpu.memory_space<vmem>>, vector<1x1x128x256xbf16>
    %45 = vector.shape_cast %44 : vector<1x1x128x256xbf16> to vector<128x256xbf16>
    %46 = arith.truncf %41 : vector<8x128xf32> to vector<8x128xbf16>
    %cst_32 = arith.constant dense<0.000000e+00> : vector<8x256xf32>
    %47 = tpu.matmul %46, %45, %cst_32 {dimension_numbers = #tpu.dot_dimension_numbers<[1], [0], [0], [1], [0, 0, 1, 1], [], []>} : vector<8x128xbf16>, vector<128x256xbf16>, vector<8x256xf32> -> vector<8x256xf32>
    %c1_i32_33 = arith.constant 1 : i32
    %48 = tpu.dynamic_rotate %41 by %c1_i32_33 dim 0 : vector<8x128xf32>, i32 -> vector<8x128xf32>
    %c1_34 = arith.constant 1 : index
    %c1_35 = arith.constant 1 : index
    %c0_36 = arith.constant 0 : index
    %c0_37 = arith.constant 0 : index
    %49 = vector.load %arg3[%c1_34, %c1_35, %c0_36, %c0_37] : memref<6x2x128x256xbf16, #tpu.memory_space<vmem>>, vector<1x1x128x256xbf16>
    %50 = vector.shape_cast %49 : vector<1x1x128x256xbf16> to vector<128x256xbf16>
    %51 = arith.truncf %48 : vector<8x128xf32> to vector<8x128xbf16>
    %cst_38 = arith.constant dense<0.000000e+00> : vector<8x256xf32>
    %52 = tpu.matmul %51, %50, %cst_38 {dimension_numbers = #tpu.dot_dimension_numbers<[1], [0], [0], [1], [0, 0, 1, 1], [], []>} : vector<8x128xbf16>, vector<128x256xbf16>, vector<8x256xf32> -> vector<8x256xf32>
    %53 = arith.addf %47, %52 : vector<8x256xf32>
    %54 = vector.extract_strided_slice %53 {offsets = [0, 0], sizes = [8, 128], strides = [1, 1]} : vector<8x256xf32> to vector<8x128xf32>
    %55 = math.tanh %54 : vector<8x128xf32>
    %56 = vector.extract_strided_slice %53 {offsets = [0, 128], sizes = [8, 128], strides = [1, 1]} : vector<8x256xf32> to vector<8x128xf32>
    %57 = arith.negf %56 : vector<8x128xf32>
    %58 = math.exp %57 : vector<8x128xf32>
    %cst_39 = arith.constant 1.000000e+00 : f32
    %59 = vector.broadcast %cst_39 : f32 to vector<8x128xf32>
    %60 = arith.addf %59, %58 : vector<8x128xf32>
    %61 = arith.divf %59, %60 : vector<8x128xf32>
    %62 = arith.mulf %55, %61 : vector<8x128xf32>
    %c1_40 = arith.constant 1 : index
    %c0_41 = arith.constant 0 : index
    %c0_42 = arith.constant 0 : index
    %63 = vector.load %arg4[%c1_40, %c0_41, %c0_42] : memref<6x128x192xbf16, #tpu.memory_space<vmem>>, vector<1x128x192xbf16>
    %64 = vector.shape_cast %63 : vector<1x128x192xbf16> to vector<128x192xbf16>
    %65 = arith.truncf %62 : vector<8x128xf32> to vector<8x128xbf16>
    %cst_43 = arith.constant dense<0.000000e+00> : vector<8x192xf32>
    %66 = tpu.matmul %65, %64, %cst_43 {dimension_numbers = #tpu.dot_dimension_numbers<[1], [0], [0], [1], [0, 0, 1, 1], [], []>} : vector<8x128xbf16>, vector<128x192xbf16>, vector<8x192xf32> -> vector<8x192xf32>
    %67 = vector.extract_strided_slice %66 {offsets = [0, 0], sizes = [8, 128], strides = [1, 1]} : vector<8x192xf32> to vector<8x128xf32>
    %c1_44 = arith.constant 1 : index
    %c0_45 = arith.constant 0 : index
    %c0_46 = arith.constant 0 : index
    %68 = vector.load %arg5[%c1_44, %c0_45, %c0_46] : memref<6x1x128xf32, #tpu.memory_space<vmem>>, vector<1x1x128xf32>
    %69 = vector.shape_cast %68 : vector<1x1x128xf32> to vector<1x128xf32>
    %70 = vector.broadcast %69 : vector<1x128xf32> to vector<8x128xf32>
    %71 = arith.addf %67, %70 : vector<8x128xf32>
    %72 = arith.addf %71, %41 : vector<8x128xf32>
    %73 = vector.extract_strided_slice %66 {offsets = [0, 128], sizes = [8, 64], strides = [1, 1]} : vector<8x192xf32> to vector<8x64xf32>
    %74 = arith.addf %43, %73 : vector<8x64xf32>
    %c2 = arith.constant 2 : index
    %c0_47 = arith.constant 0 : index
    %c0_48 = arith.constant 0 : index
    %c0_49 = arith.constant 0 : index
    %75 = vector.load %arg3[%c2, %c0_47, %c0_48, %c0_49] : memref<6x2x128x256xbf16, #tpu.memory_space<vmem>>, vector<1x1x128x256xbf16>
    %76 = vector.shape_cast %75 : vector<1x1x128x256xbf16> to vector<128x256xbf16>
    %77 = arith.truncf %72 : vector<8x128xf32> to vector<8x128xbf16>
    %cst_50 = arith.constant dense<0.000000e+00> : vector<8x256xf32>
    %78 = tpu.matmul %77, %76, %cst_50 {dimension_numbers = #tpu.dot_dimension_numbers<[1], [0], [0], [1], [0, 0, 1, 1], [], []>} : vector<8x128xbf16>, vector<128x256xbf16>, vector<8x256xf32> -> vector<8x256xf32>
    %c1_i32_51 = arith.constant 1 : i32
    %79 = tpu.dynamic_rotate %72 by %c1_i32_51 dim 0 : vector<8x128xf32>, i32 -> vector<8x128xf32>
    %c2_52 = arith.constant 2 : index
    %c1_53 = arith.constant 1 : index
    %c0_54 = arith.constant 0 : index
    %c0_55 = arith.constant 0 : index
    %80 = vector.load %arg3[%c2_52, %c1_53, %c0_54, %c0_55] : memref<6x2x128x256xbf16, #tpu.memory_space<vmem>>, vector<1x1x128x256xbf16>
    %81 = vector.shape_cast %80 : vector<1x1x128x256xbf16> to vector<128x256xbf16>
    %82 = arith.truncf %79 : vector<8x128xf32> to vector<8x128xbf16>
    %cst_56 = arith.constant dense<0.000000e+00> : vector<8x256xf32>
    %83 = tpu.matmul %82, %81, %cst_56 {dimension_numbers = #tpu.dot_dimension_numbers<[1], [0], [0], [1], [0, 0, 1, 1], [], []>} : vector<8x128xbf16>, vector<128x256xbf16>, vector<8x256xf32> -> vector<8x256xf32>
    %84 = arith.addf %78, %83 : vector<8x256xf32>
    %85 = vector.extract_strided_slice %84 {offsets = [0, 0], sizes = [8, 128], strides = [1, 1]} : vector<8x256xf32> to vector<8x128xf32>
    %86 = math.tanh %85 : vector<8x128xf32>
    %87 = vector.extract_strided_slice %84 {offsets = [0, 128], sizes = [8, 128], strides = [1, 1]} : vector<8x256xf32> to vector<8x128xf32>
    %88 = arith.negf %87 : vector<8x128xf32>
    %89 = math.exp %88 : vector<8x128xf32>
    %cst_57 = arith.constant 1.000000e+00 : f32
    %90 = vector.broadcast %cst_57 : f32 to vector<8x128xf32>
    %91 = arith.addf %90, %89 : vector<8x128xf32>
    %92 = arith.divf %90, %91 : vector<8x128xf32>
    %93 = arith.mulf %86, %92 : vector<8x128xf32>
    %c2_58 = arith.constant 2 : index
    %c0_59 = arith.constant 0 : index
    %c0_60 = arith.constant 0 : index
    %94 = vector.load %arg4[%c2_58, %c0_59, %c0_60] : memref<6x128x192xbf16, #tpu.memory_space<vmem>>, vector<1x128x192xbf16>
    %95 = vector.shape_cast %94 : vector<1x128x192xbf16> to vector<128x192xbf16>
    %96 = arith.truncf %93 : vector<8x128xf32> to vector<8x128xbf16>
    %cst_61 = arith.constant dense<0.000000e+00> : vector<8x192xf32>
    %97 = tpu.matmul %96, %95, %cst_61 {dimension_numbers = #tpu.dot_dimension_numbers<[1], [0], [0], [1], [0, 0, 1, 1], [], []>} : vector<8x128xbf16>, vector<128x192xbf16>, vector<8x192xf32> -> vector<8x192xf32>
    %98 = vector.extract_strided_slice %97 {offsets = [0, 0], sizes = [8, 128], strides = [1, 1]} : vector<8x192xf32> to vector<8x128xf32>
    %c2_62 = arith.constant 2 : index
    %c0_63 = arith.constant 0 : index
    %c0_64 = arith.constant 0 : index
    %99 = vector.load %arg5[%c2_62, %c0_63, %c0_64] : memref<6x1x128xf32, #tpu.memory_space<vmem>>, vector<1x1x128xf32>
    %100 = vector.shape_cast %99 : vector<1x1x128xf32> to vector<1x128xf32>
    %101 = vector.broadcast %100 : vector<1x128xf32> to vector<8x128xf32>
    %102 = arith.addf %98, %101 : vector<8x128xf32>
    %103 = arith.addf %102, %72 : vector<8x128xf32>
    %104 = vector.extract_strided_slice %97 {offsets = [0, 128], sizes = [8, 64], strides = [1, 1]} : vector<8x192xf32> to vector<8x64xf32>
    %105 = arith.addf %74, %104 : vector<8x64xf32>
    %c3 = arith.constant 3 : index
    %c0_65 = arith.constant 0 : index
    %c0_66 = arith.constant 0 : index
    %c0_67 = arith.constant 0 : index
    %106 = vector.load %arg3[%c3, %c0_65, %c0_66, %c0_67] : memref<6x2x128x256xbf16, #tpu.memory_space<vmem>>, vector<1x1x128x256xbf16>
    %107 = vector.shape_cast %106 : vector<1x1x128x256xbf16> to vector<128x256xbf16>
    %108 = arith.truncf %103 : vector<8x128xf32> to vector<8x128xbf16>
    %cst_68 = arith.constant dense<0.000000e+00> : vector<8x256xf32>
    %109 = tpu.matmul %108, %107, %cst_68 {dimension_numbers = #tpu.dot_dimension_numbers<[1], [0], [0], [1], [0, 0, 1, 1], [], []>} : vector<8x128xbf16>, vector<128x256xbf16>, vector<8x256xf32> -> vector<8x256xf32>
    %c1_i32_69 = arith.constant 1 : i32
    %110 = tpu.dynamic_rotate %103 by %c1_i32_69 dim 0 : vector<8x128xf32>, i32 -> vector<8x128xf32>
    %c3_70 = arith.constant 3 : index
    %c1_71 = arith.constant 1 : index
    %c0_72 = arith.constant 0 : index
    %c0_73 = arith.constant 0 : index
    %111 = vector.load %arg3[%c3_70, %c1_71, %c0_72, %c0_73] : memref<6x2x128x256xbf16, #tpu.memory_space<vmem>>, vector<1x1x128x256xbf16>
    %112 = vector.shape_cast %111 : vector<1x1x128x256xbf16> to vector<128x256xbf16>
    %113 = arith.truncf %110 : vector<8x128xf32> to vector<8x128xbf16>
    %cst_74 = arith.constant dense<0.000000e+00> : vector<8x256xf32>
    %114 = tpu.matmul %113, %112, %cst_74 {dimension_numbers = #tpu.dot_dimension_numbers<[1], [0], [0], [1], [0, 0, 1, 1], [], []>} : vector<8x128xbf16>, vector<128x256xbf16>, vector<8x256xf32> -> vector<8x256xf32>
    %115 = arith.addf %109, %114 : vector<8x256xf32>
    %116 = vector.extract_strided_slice %115 {offsets = [0, 0], sizes = [8, 128], strides = [1, 1]} : vector<8x256xf32> to vector<8x128xf32>
    %117 = math.tanh %116 : vector<8x128xf32>
    %118 = vector.extract_strided_slice %115 {offsets = [0, 128], sizes = [8, 128], strides = [1, 1]} : vector<8x256xf32> to vector<8x128xf32>
    %119 = arith.negf %118 : vector<8x128xf32>
    %120 = math.exp %119 : vector<8x128xf32>
    %cst_75 = arith.constant 1.000000e+00 : f32
    %121 = vector.broadcast %cst_75 : f32 to vector<8x128xf32>
    %122 = arith.addf %121, %120 : vector<8x128xf32>
    %123 = arith.divf %121, %122 : vector<8x128xf32>
    %124 = arith.mulf %117, %123 : vector<8x128xf32>
    %c3_76 = arith.constant 3 : index
    %c0_77 = arith.constant 0 : index
    %c0_78 = arith.constant 0 : index
    %125 = vector.load %arg4[%c3_76, %c0_77, %c0_78] : memref<6x128x192xbf16, #tpu.memory_space<vmem>>, vector<1x128x192xbf16>
    %126 = vector.shape_cast %125 : vector<1x128x192xbf16> to vector<128x192xbf16>
    %127 = arith.truncf %124 : vector<8x128xf32> to vector<8x128xbf16>
    %cst_79 = arith.constant dense<0.000000e+00> : vector<8x192xf32>
    %128 = tpu.matmul %127, %126, %cst_79 {dimension_numbers = #tpu.dot_dimension_numbers<[1], [0], [0], [1], [0, 0, 1, 1], [], []>} : vector<8x128xbf16>, vector<128x192xbf16>, vector<8x192xf32> -> vector<8x192xf32>
    %129 = vector.extract_strided_slice %128 {offsets = [0, 0], sizes = [8, 128], strides = [1, 1]} : vector<8x192xf32> to vector<8x128xf32>
    %c3_80 = arith.constant 3 : index
    %c0_81 = arith.constant 0 : index
    %c0_82 = arith.constant 0 : index
    %130 = vector.load %arg5[%c3_80, %c0_81, %c0_82] : memref<6x1x128xf32, #tpu.memory_space<vmem>>, vector<1x1x128xf32>
    %131 = vector.shape_cast %130 : vector<1x1x128xf32> to vector<1x128xf32>
    %132 = vector.broadcast %131 : vector<1x128xf32> to vector<8x128xf32>
    %133 = arith.addf %129, %132 : vector<8x128xf32>
    %134 = arith.addf %133, %103 : vector<8x128xf32>
    %135 = vector.extract_strided_slice %128 {offsets = [0, 128], sizes = [8, 64], strides = [1, 1]} : vector<8x192xf32> to vector<8x64xf32>
    %136 = arith.addf %105, %135 : vector<8x64xf32>
    %c4 = arith.constant 4 : index
    %c0_83 = arith.constant 0 : index
    %c0_84 = arith.constant 0 : index
    %c0_85 = arith.constant 0 : index
    %137 = vector.load %arg3[%c4, %c0_83, %c0_84, %c0_85] : memref<6x2x128x256xbf16, #tpu.memory_space<vmem>>, vector<1x1x128x256xbf16>
    %138 = vector.shape_cast %137 : vector<1x1x128x256xbf16> to vector<128x256xbf16>
    %139 = arith.truncf %134 : vector<8x128xf32> to vector<8x128xbf16>
    %cst_86 = arith.constant dense<0.000000e+00> : vector<8x256xf32>
    %140 = tpu.matmul %139, %138, %cst_86 {dimension_numbers = #tpu.dot_dimension_numbers<[1], [0], [0], [1], [0, 0, 1, 1], [], []>} : vector<8x128xbf16>, vector<128x256xbf16>, vector<8x256xf32> -> vector<8x256xf32>
    %c1_i32_87 = arith.constant 1 : i32
    %141 = tpu.dynamic_rotate %134 by %c1_i32_87 dim 0 : vector<8x128xf32>, i32 -> vector<8x128xf32>
    %c4_88 = arith.constant 4 : index
    %c1_89 = arith.constant 1 : index
    %c0_90 = arith.constant 0 : index
    %c0_91 = arith.constant 0 : index
    %142 = vector.load %arg3[%c4_88, %c1_89, %c0_90, %c0_91] : memref<6x2x128x256xbf16, #tpu.memory_space<vmem>>, vector<1x1x128x256xbf16>
    %143 = vector.shape_cast %142 : vector<1x1x128x256xbf16> to vector<128x256xbf16>
    %144 = arith.truncf %141 : vector<8x128xf32> to vector<8x128xbf16>
    %cst_92 = arith.constant dense<0.000000e+00> : vector<8x256xf32>
    %145 = tpu.matmul %144, %143, %cst_92 {dimension_numbers = #tpu.dot_dimension_numbers<[1], [0], [0], [1], [0, 0, 1, 1], [], []>} : vector<8x128xbf16>, vector<128x256xbf16>, vector<8x256xf32> -> vector<8x256xf32>
    %146 = arith.addf %140, %145 : vector<8x256xf32>
    %147 = vector.extract_strided_slice %146 {offsets = [0, 0], sizes = [8, 128], strides = [1, 1]} : vector<8x256xf32> to vector<8x128xf32>
    %148 = math.tanh %147 : vector<8x128xf32>
    %149 = vector.extract_strided_slice %146 {offsets = [0, 128], sizes = [8, 128], strides = [1, 1]} : vector<8x256xf32> to vector<8x128xf32>
    %150 = arith.negf %149 : vector<8x128xf32>
    %151 = math.exp %150 : vector<8x128xf32>
    %cst_93 = arith.constant 1.000000e+00 : f32
    %152 = vector.broadcast %cst_93 : f32 to vector<8x128xf32>
    %153 = arith.addf %152, %151 : vector<8x128xf32>
    %154 = arith.divf %152, %153 : vector<8x128xf32>
    %155 = arith.mulf %148, %154 : vector<8x128xf32>
    %c4_94 = arith.constant 4 : index
    %c0_95 = arith.constant 0 : index
    %c0_96 = arith.constant 0 : index
    %156 = vector.load %arg4[%c4_94, %c0_95, %c0_96] : memref<6x128x192xbf16, #tpu.memory_space<vmem>>, vector<1x128x192xbf16>
    %157 = vector.shape_cast %156 : vector<1x128x192xbf16> to vector<128x192xbf16>
    %158 = arith.truncf %155 : vector<8x128xf32> to vector<8x128xbf16>
    %cst_97 = arith.constant dense<0.000000e+00> : vector<8x192xf32>
    %159 = tpu.matmul %158, %157, %cst_97 {dimension_numbers = #tpu.dot_dimension_numbers<[1], [0], [0], [1], [0, 0, 1, 1], [], []>} : vector<8x128xbf16>, vector<128x192xbf16>, vector<8x192xf32> -> vector<8x192xf32>
    %160 = vector.extract_strided_slice %159 {offsets = [0, 0], sizes = [8, 128], strides = [1, 1]} : vector<8x192xf32> to vector<8x128xf32>
    %c4_98 = arith.constant 4 : index
    %c0_99 = arith.constant 0 : index
    %c0_100 = arith.constant 0 : index
    %161 = vector.load %arg5[%c4_98, %c0_99, %c0_100] : memref<6x1x128xf32, #tpu.memory_space<vmem>>, vector<1x1x128xf32>
    %162 = vector.shape_cast %161 : vector<1x1x128xf32> to vector<1x128xf32>
    %163 = vector.broadcast %162 : vector<1x128xf32> to vector<8x128xf32>
    %164 = arith.addf %160, %163 : vector<8x128xf32>
    %165 = arith.addf %164, %134 : vector<8x128xf32>
    %166 = vector.extract_strided_slice %159 {offsets = [0, 128], sizes = [8, 64], strides = [1, 1]} : vector<8x192xf32> to vector<8x64xf32>
    %167 = arith.addf %136, %166 : vector<8x64xf32>
    %c5 = arith.constant 5 : index
    %c0_101 = arith.constant 0 : index
    %c0_102 = arith.constant 0 : index
    %c0_103 = arith.constant 0 : index
    %168 = vector.load %arg3[%c5, %c0_101, %c0_102, %c0_103] : memref<6x2x128x256xbf16, #tpu.memory_space<vmem>>, vector<1x1x128x256xbf16>
    %169 = vector.shape_cast %168 : vector<1x1x128x256xbf16> to vector<128x256xbf16>
    %170 = arith.truncf %165 : vector<8x128xf32> to vector<8x128xbf16>
    %cst_104 = arith.constant dense<0.000000e+00> : vector<8x256xf32>
    %171 = tpu.matmul %170, %169, %cst_104 {dimension_numbers = #tpu.dot_dimension_numbers<[1], [0], [0], [1], [0, 0, 1, 1], [], []>} : vector<8x128xbf16>, vector<128x256xbf16>, vector<8x256xf32> -> vector<8x256xf32>
    %c1_i32_105 = arith.constant 1 : i32
    %172 = tpu.dynamic_rotate %165 by %c1_i32_105 dim 0 : vector<8x128xf32>, i32 -> vector<8x128xf32>
    %c5_106 = arith.constant 5 : index
    %c1_107 = arith.constant 1 : index
    %c0_108 = arith.constant 0 : index
    %c0_109 = arith.constant 0 : index
    %173 = vector.load %arg3[%c5_106, %c1_107, %c0_108, %c0_109] : memref<6x2x128x256xbf16, #tpu.memory_space<vmem>>, vector<1x1x128x256xbf16>
    %174 = vector.shape_cast %173 : vector<1x1x128x256xbf16> to vector<128x256xbf16>
    %175 = arith.truncf %172 : vector<8x128xf32> to vector<8x128xbf16>
    %cst_110 = arith.constant dense<0.000000e+00> : vector<8x256xf32>
    %176 = tpu.matmul %175, %174, %cst_110 {dimension_numbers = #tpu.dot_dimension_numbers<[1], [0], [0], [1], [0, 0, 1, 1], [], []>} : vector<8x128xbf16>, vector<128x256xbf16>, vector<8x256xf32> -> vector<8x256xf32>
    %177 = arith.addf %171, %176 : vector<8x256xf32>
    %178 = vector.extract_strided_slice %177 {offsets = [0, 0], sizes = [8, 128], strides = [1, 1]} : vector<8x256xf32> to vector<8x128xf32>
    %179 = math.tanh %178 : vector<8x128xf32>
    %180 = vector.extract_strided_slice %177 {offsets = [0, 128], sizes = [8, 128], strides = [1, 1]} : vector<8x256xf32> to vector<8x128xf32>
    %181 = arith.negf %180 : vector<8x128xf32>
    %182 = math.exp %181 : vector<8x128xf32>
    %cst_111 = arith.constant 1.000000e+00 : f32
    %183 = vector.broadcast %cst_111 : f32 to vector<8x128xf32>
    %184 = arith.addf %183, %182 : vector<8x128xf32>
    %185 = arith.divf %183, %184 : vector<8x128xf32>
    %186 = arith.mulf %179, %185 : vector<8x128xf32>
    %c5_112 = arith.constant 5 : index
    %c0_113 = arith.constant 0 : index
    %c0_114 = arith.constant 0 : index
    %187 = vector.load %arg4[%c5_112, %c0_113, %c0_114] : memref<6x128x192xbf16, #tpu.memory_space<vmem>>, vector<1x128x192xbf16>
    %188 = vector.shape_cast %187 : vector<1x128x192xbf16> to vector<128x192xbf16>
    %189 = arith.truncf %186 : vector<8x128xf32> to vector<8x128xbf16>
    %cst_115 = arith.constant dense<0.000000e+00> : vector<8x192xf32>
    %190 = tpu.matmul %189, %188, %cst_115 {dimension_numbers = #tpu.dot_dimension_numbers<[1], [0], [0], [1], [0, 0, 1, 1], [], []>} : vector<8x128xbf16>, vector<128x192xbf16>, vector<8x192xf32> -> vector<8x192xf32>
    %191 = vector.extract_strided_slice %190 {offsets = [0, 128], sizes = [8, 64], strides = [1, 1]} : vector<8x192xf32> to vector<8x64xf32>
    %192 = arith.addf %167, %191 : vector<8x64xf32>
    %c0_116 = arith.constant 0 : index
    %c0_117 = arith.constant 0 : index
    %193 = vector.load %arg6[%c0_116, %c0_117] : memref<1x64xf32, #tpu.memory_space<vmem>>, vector<1x64xf32>
    %194 = vector.broadcast %193 : vector<1x64xf32> to vector<8x64xf32>
    %195 = arith.addf %192, %194 : vector<8x64xf32>
    %cst_118 = arith.constant 0.000000e+00 : f32
    %196 = vector.broadcast %cst_118 : f32 to vector<8x64xf32>
    %197 = arith.maximumf %195, %196 : vector<8x64xf32>
    %c0_119 = arith.constant 0 : index
    %c0_120 = arith.constant 0 : index
    %198 = vector.load %arg7[%c0_119, %c0_120] : memref<64x64xbf16, #tpu.memory_space<vmem>>, vector<64x64xbf16>
    %199 = arith.truncf %197 : vector<8x64xf32> to vector<8x64xbf16>
    %cst_121 = arith.constant dense<0.000000e+00> : vector<8x64xf32>
    %200 = tpu.matmul %199, %198, %cst_121 {dimension_numbers = #tpu.dot_dimension_numbers<[1], [0], [0], [1], [0, 0, 1, 1], [], []>} : vector<8x64xbf16>, vector<64x64xbf16>, vector<8x64xf32> -> vector<8x64xf32>
    %c0_122 = arith.constant 0 : index
    %c0_123 = arith.constant 0 : index
    %201 = vector.load %arg8[%c0_122, %c0_123] : memref<1x64xf32, #tpu.memory_space<vmem>>, vector<1x64xf32>
    %202 = vector.broadcast %201 : vector<1x64xf32> to vector<8x64xf32>
    %203 = arith.addf %200, %202 : vector<8x64xf32>
    %cst_124 = arith.constant 0.000000e+00 : f32
    %204 = vector.broadcast %cst_124 : f32 to vector<8x64xf32>
    %205 = arith.maximumf %203, %204 : vector<8x64xf32>
    %c0_125 = arith.constant 0 : index
    %c0_126 = arith.constant 0 : index
    %206 = vector.load %arg9[%c0_125, %c0_126] : memref<64x64xbf16, #tpu.memory_space<vmem>>, vector<64x64xbf16>
    %207 = arith.truncf %205 : vector<8x64xf32> to vector<8x64xbf16>
    %cst_127 = arith.constant dense<0.000000e+00> : vector<8x64xf32>
    %208 = tpu.matmul %207, %206, %cst_127 {dimension_numbers = #tpu.dot_dimension_numbers<[1], [0], [0], [1], [0, 0, 1, 1], [], []>} : vector<8x64xbf16>, vector<64x64xbf16>, vector<8x64xf32> -> vector<8x64xf32>
    %c7_i32 = arith.constant 7 : i32
    %209 = tpu.dynamic_rotate %205 by %c7_i32 dim 0 : vector<8x64xf32>, i32 -> vector<8x64xf32>
    %c0_128 = arith.constant 0 : index
    %c0_129 = arith.constant 0 : index
    %210 = vector.load %arg10[%c0_128, %c0_129] : memref<64x64xbf16, #tpu.memory_space<vmem>>, vector<64x64xbf16>
    %211 = arith.truncf %209 : vector<8x64xf32> to vector<8x64xbf16>
    %cst_130 = arith.constant dense<0.000000e+00> : vector<8x64xf32>
    %212 = tpu.matmul %211, %210, %cst_130 {dimension_numbers = #tpu.dot_dimension_numbers<[1], [0], [0], [1], [0, 0, 1, 1], [], []>} : vector<8x64xbf16>, vector<64x64xbf16>, vector<8x64xf32> -> vector<8x64xf32>
    %213 = arith.addf %208, %212 : vector<8x64xf32>
    %c0_131 = arith.constant 0 : index
    %c0_132 = arith.constant 0 : index
    %c0_133 = arith.constant 0 : index
    %214 = vector.load %arg11[%c0_131, %c0_132, %c0_133] : memref<1x8x64xf32, #tpu.memory_space<vmem>>, vector<1x8x64xf32>
    %215 = vector.shape_cast %214 : vector<1x8x64xf32> to vector<8x64xf32>
    %216 = vector.shape_cast %213 : vector<8x64xf32> to vector<1x8x64xf32>
    tpu.vector_store %arg11[%c0_131, %c0_132, %c0_133], %216 {strides = array<i32>} : memref<1x8x64xf32, #tpu.memory_space<vmem>>, vector<1x8x64xf32>,
    return
  }
  func.func @transform_0(%arg0: i32) -> (i32, i32, i32) {
    %c0_i32 = arith.constant 0 : i32
    %c0_i32_0 = arith.constant 0 : i32
    %c0_i32_1 = arith.constant 0 : i32
    return %arg0, %c0_i32, %c0_i32_0 : i32, i32, i32
  }
  func.func @transform_1(%arg0: i32) -> (i32, i32, i32) {
    %c0_i32 = arith.constant 0 : i32
    %c0_i32_0 = arith.constant 0 : i32
    %c0_i32_1 = arith.constant 0 : i32
    %c0_i32_2 = arith.constant 0 : i32
    return %c0_i32, %c0_i32_0, %c0_i32_1 : i32, i32, i32
  }
  func.func @transform_2(%arg0: i32) -> (i32, i32, i32, i32) {
    %c0_i32 = arith.constant 0 : i32
    %c0_i32_0 = arith.constant 0 : i32
    %c0_i32_1 = arith.constant 0 : i32
    %c0_i32_2 = arith.constant 0 : i32
    %c0_i32_3 = arith.constant 0 : i32
    return %c0_i32, %c0_i32_0, %c0_i32_1, %c0_i32_2 : i32, i32, i32, i32
  }
  func.func @transform_3(%arg0: i32) -> (i32, i32, i32) {
    %c0_i32 = arith.constant 0 : i32
    %c0_i32_0 = arith.constant 0 : i32
    %c0_i32_1 = arith.constant 0 : i32
    %c0_i32_2 = arith.constant 0 : i32
    return %c0_i32, %c0_i32_0, %c0_i32_1 : i32, i32, i32
  }
  func.func @transform_4(%arg0: i32) -> (i32, i32, i32) {
    %c0_i32 = arith.constant 0 : i32
    %c0_i32_0 = arith.constant 0 : i32
    %c0_i32_1 = arith.constant 0 : i32
    %c0_i32_2 = arith.constant 0 : i32
    return %c0_i32, %c0_i32_0, %c0_i32_1 : i32, i32, i32
  }
  func.func @transform_5(%arg0: i32) -> (i32, i32) {
    %c0_i32 = arith.constant 0 : i32
    %c0_i32_0 = arith.constant 0 : i32
    %c0_i32_1 = arith.constant 0 : i32
    return %c0_i32, %c0_i32_0 : i32, i32
  }
  func.func @transform_6(%arg0: i32) -> (i32, i32) {
    %c0_i32 = arith.constant 0 : i32
    %c0_i32_0 = arith.constant 0 : i32
    %c0_i32_1 = arith.constant 0 : i32
    return %c0_i32, %c0_i32_0 : i32, i32
  }
  func.func @transform_7(%arg0: i32) -> (i32, i32) {
    %c0_i32 = arith.constant 0 : i32
    %c0_i32_0 = arith.constant 0 : i32
    %c0_i32_1 = arith.constant 0 : i32
    return %c0_i32, %c0_i32_0 : i32, i32
  }
  func.func @transform_8(%arg0: i32) -> (i32, i32) {
    %c0_i32 = arith.constant 0 : i32
    %c0_i32_0 = arith.constant 0 : i32
    %c0_i32_1 = arith.constant 0 : i32
    return %c0_i32, %c0_i32_0 : i32, i32
  }
  func.func @transform_9(%arg0: i32) -> (i32, i32) {
    %c0_i32 = arith.constant 0 : i32
    %c0_i32_0 = arith.constant 0 : i32
    %c0_i32_1 = arith.constant 0 : i32
    return %c0_i32, %c0_i32_0 : i32, i32
  }
  func.func @transform_10(%arg0: i32) -> (i32, i32, i32) {
    %c0_i32 = arith.constant 0 : i32
    %c0_i32_0 = arith.constant 0 : i32
    %c0_i32_1 = arith.constant 0 : i32
    return %arg0, %c0_i32, %c0_i32_0 : i32, i32, i32
  }
}

</mosaic_0001>

<bundles_post_ra>
// kernel: tpu_custom_call.1
= control target key start
LH: loop header
LB: loop body
LE: loop exit
PB: predicated region body
PF: predicated region fallthrough
CT: control target
= control target key end

     0   :  { %15 = vsyncpa [#allocation3], 0  ;;  %s5264_s0 = inlined_call_operand.vmem [shape: f32[2,8,64], index: 0, kind: input, shape index: {}]   ;;  %s5265_s1 = inlined_call_operand.vmem [shape: bf16[2,64,128], index: 1, kind: input, shape index: {}]   ;;  %s5266_s2 = inlined_call_operand.hbm [shape: bf16[6,2,128,256], index: 2, kind: input, shape index: {}]   ;;  %s5267_s3 = inlined_call_operand.vmem [shape: bf16[6,128,192], index: 3, kind: input, shape index: {}]   ;;  %s5268_s4 = inlined_call_operand.vmem [shape: f32[6,1,128], index: 4, kind: input, shape index: {}]   ;;  %s5269_s5 = inlined_call_operand.vmem [shape: f32[1,64], index: 5, kind: input, shape index: {}]   ;;  %s5270_s6 = inlined_call_operand.vmem [shape: bf16[64,64], index: 6, kind: input, shape index: {}]   ;;  %s5271_s7 = inlined_call_operand.vmem [shape: f32[1,64], index: 7, kind: input, shape index: {}]   ;;  %s5272_s8 = inlined_call_operand.vmem [shape: bf16[64,64], index: 8, kind: input, shape index: {}]   ;;  %s5273_s9 = inlined_call_operand.vmem [shape: bf16[64,64], index: 9, kind: input, shape index: {}]   ;;  %s5274_s10 = inlined_call_operand.hbm [shape: f32[2,8,64], index: 10, kind: output, shape index: {}]  }
   0x1   :  { %16 = vsyncpa [#allocation4], 0 }
   0x2   :  { %18 = vsyncpa [#allocation4 + $0x1], 0  ;;  %s4679_s13 = smov 0   ;;  %s4681_s14 = smov 0  }
   0x3   :  { %s4683_s15 = smov 0   ;;  %s4685_s16 = smov 0  }
   0x4 LB: > { %s4700_s17 = sadd.s32 4294967295, %s4615_s16   ;;  %s3467_s18 = sadd.s32 4294967294, %s4615_s16   ;;  %s4615_s16 = sphi %s4685_s16, %s5282_s16   ;;  %s4611_s15 = sphi %s4683_s15, %s5281_s15   ;;  %s4607_s14 = sphi %s4681_s14, %s5280_s14   ;;  %s4603_s13 = sphi %s4679_s13, %s5279_s13  }
   0x5   : > { %s4704_s19 = sadd.s32 1, %s4615_s16   ;;  %s246_s20 = sadd.s32 1, %s4611_s15 }
   0x6   : > { %s243_s21 = ssub.s32 %s4615_s16, %s4704_s19  ;;  %p256_p0 = scmp.ne.s32.totalorder %s4611_s15, %s4607_s14 }
   0x7   : > { %p244_p1 = scmp.eq.s32.totalorder %s243_s21, 0  ;;  %p257_p2 = scmp.eq.s32.totalorder %s4700_s17, 1 }
   0x8   : > { %p262_p3 = scmp.ne.s32.totalorder %s4607_s14, %s4603_s13  ;;  %p263_p4 = scmp.eq.s32.totalorder %s3467_s18, 1 }
   0x9   : > { %s4715_s22 = scalar_select %p244_p1, %s4611_s15, %s246_s20  }
   0xa   : > { %p4717_p5 = por %p257_p2, %p256_p0  ;;  %p4721_p6 = por %p263_p4, %p262_p3 }
   0xb   : > { %p3468_p7 = scmp.ge.s32.totalorder %s4615_s16, 1  ;;  %p270_p8 = scmp.lt.s32.totalorder %s4615_s16, 3 }
   0xc   : > { %s5276_s24 = scalar_select %p4721_p6, 1, 0 }
   0xd   : > { %p3996_p9 = scmp.eq.s32.totalorder %s4700_s17, 0  ;;  %p4728_p10 = pnand %p3468_p7, %p270_p8 }
   0xe   : > { %s4617_s26 = smov [#allocation2]  }
   0xf   : > { %s285_s27 = sshll.u32 %s4617_s26, 4  ;;  %p3988_p11 = pneg %p4728_p10  ;;  %s286_s27 = int_to_ptr.vmem [resolvable:$true] %s285_s27 }
  0x10   : > { %s4536_s28 = scalar_lea.vmem %s286_s27, 24576  ;;  %p4544_p3 = scmp.lt.s32.totalorder %s286_s27, %s286_s27 }
  0x11   : > { %p3989_p12 = pnand %p3996_p9, %p3988_p11  ;;  %p4537_p0 = scmp.ne.s32.totalorder %s286_s27, %s4536_s28 }
  0x12   : > { %p4545_p4 = scmp.lt.s32.totalorder %s4536_s28, %s4536_s28 }
  0x13   : > { %p4527_p13 = pneg %p3989_p12 }
  0x14   : > { %p4546_p6 = por %p4545_p4, %p4544_p3 }
  0x15   : > { %p4539_p1 = pnand %p4537_p0, %p4527_p13 }
  0x17   : > { %p4540_p2 = pneg %p4539_p1 }
  0x19   : > { %p4547_p7 = pnand %p4546_p6, %p4540_p2 }
  0x1b   : > { %4550 = shalt.err (!%p4547_p7)
}
  0x1c   : > { %s4618_s29 = smov 128   ;;  %s4619_s30 = smov 8  }
  0x1d   : > { %3991 = dma.hbm_to_vmem [thread:$0]  (!%p3989_p12), %s5266_s2, 24576, %s286_s27, [#allocation3], %s4618_s29, %s4618_s29, %s4619_s30  }
  0x1e   : > { %329 = sbr.rel (%p4728_p10) target bundleno = 3269 (0xcc5), region = 60 }
  0x23   : > { %4594 = dma.done.wait (%p3996_p9), [#allocation3], 24576  }
  0x24   : > { %4596 = vsyncadd (%p3996_p9), [#allocation3], 4294942720  ;;  %v4620_v0 = vmov 0.0   ;;  %p366_p6 = scmp.lt.s32.totalorder %s4700_s17, 1  ;;  %vm4621_vm0 = vmmov 0   ;;  %v4037_v1 = vld [vmem:[%s5265_s1 + $0x38] sm:$0xff]  }
  0x25   : > { %3922 = vmatprep.subr.bf16.mxu0 %v4620_v0  ;;  %3934 = vmatprep.subr.bf16.mxu1 %v4620_v0  ;;  %v4038_v2 = vld [vmem:[%s5265_s1 + $0x18] sm:$0xff]   ;;  %v4039_v3 = vld [vmem:[%s5265_s1 + $0x30] sm:$0xff]   ;;  %v4041_v5 = vld [vmem:[%s5265_s1 + $0x28] sm:$0xff]   ;;  %vm416_vm1 = vcmask 523264   ;;  %v4622_v45 = vmov 0   ;;  %s363_s11 = sand.u32 1, %s4607_s14  }
  0x26   : > { %3930 = vmatprep.mubr.msk.bf16.mxu0 %vm4621_vm0, %v4620_v0  ;;  %3942 = vmatprep.mubr.msk.bf16.mxu1 %vm4621_vm0, %v4620_v0  ;;  %s367_s18 = scalar_select %p366_p6, %s4700_s17, 1  ;;  %v4040_v4 = vld [vmem:[%s5265_s1 + $0x10] sm:$0xff]   ;;  %v4042_v6 = vld [vmem:[%s5265_s1 + $0x8] sm:$0xff]   ;;  %v4043_v9 = vld [vmem:[%s5265_s1 + $0x20] sm:$0xff]  }
  0x27   : > { %3923 = vmatpush3.bf16.msra.mxu0 %v4037_v1  ;;  %3935 = vmatpush3.bf16.msra.mxu1 %v4038_v2  ;;  %v4044_v10 = vld [vmem:[%s5265_s1] sm:$0xff]   ;;  %v4050_v11 = vld [vmem:[#allocation2 + $0xf4] ss:$8 sps:$4 sm:$0xff]   ;;  %v4045_v15 = vld [vmem:[#allocation2 + $0x70] ss:$8 sps:$4 sm:$0xff]   ;;  %s3473_s12 = sshll.u32 %s363_s11, 3 }
  0x28   : > { %s3474_s29 = sshll.u32 %s367_s18, 3  ;;  %3924 = vmatprep.subr.bf16.mxu0 %v4620_v0  ;;  %3936 = vmatprep.subr.bf16.mxu1 %v4620_v0  ;;  %v4047_v12 = vld [vmem:[#allocation2 + $0x74] ss:$8 sps:$4 sm:$0xff]   ;;  %v4048_v16 = vld [vmem:[#allocation2 + $0xf0] ss:$8 sps:$4 sm:$0xff]   ;;  %s3894_s20 = sshll.u32 %s4700_s17, 7 }
  0x29   : > { %s369_s21 = scalar_lea.vmem %s5264_s0, %s3474_s29  ;;  %v4056_v17 = vld [vmem:[#allocation2 + $0xe4] ss:$8 sps:$4 sm:$0xff]   ;;  %v4051_v19 = vld [vmem:[#allocation2 + $0x60] ss:$8 sps:$4 sm:$0xff]   ;;  %v4062_v21 = vld [vmem:[#allocation2 + $0xd4] ss:$8 sps:$4 sm:$0xff]   ;;  %s5222_s27 = scalar_lea.hbm %s5274_s10, %s3894_s20 }
  0x2a   : > { %v371_v7 = vld [vmem:[%s369_s21] sm:$0xff]  ;;  %v4059_v22 = vld [vmem:[#allocation2 + $0x54] ss:$8 sps:$4 sm:$0xff]   ;;  %v4057_v23 = vld [vmem:[#allocation2 + $0x50] ss:$8 sps:$4 sm:$0xff]   ;;  %s365_s21 = scalar_lea.vmem [#allocation5], %s3473_s12 }
  0x2b   : > { %3925 = vmatpush3.bf16.msra.mxu0 %v4039_v3  ;;  %3937 = vmatpush3.bf16.msra.mxu1 %v4040_v4  ;;  %v381_v8 = vrot.slane %v371_v7, 7  ;;  %v380_v14 = vpack.c.bf16 %v371_v7, %v371_v7  ;;  %v4053_v18 = vld [vmem:[#allocation2 + $0x64] ss:$8 sps:$4 sm:$0xff]   ;;  %v4054_v20 = vld [vmem:[#allocation2 + $0xe0] ss:$8 sps:$4 sm:$0xff]   ;;  %s3396_s25 = sshll.u32 %s365_s21, 4  ;;  %s5224_s25 = int_to_ptr.vmem [resolvable:$true] %s3396_s25 }
  0x2c   : > { %3926 = vmatprep.subr.bf16.mxu0 %v4620_v0  ;;  %3938 = vmatprep.subr.bf16.mxu1 %v4620_v0  ;;  %v4060_v24 = vld [vmem:[#allocation2 + $0xd0] ss:$8 sps:$4 sm:$0xff]   ;;  %v4068_v25 = vld [vmem:[#allocation2 + $0xc4] ss:$8 sps:$4 sm:$0xff]   ;;  %v4063_v27 = vld [vmem:[#allocation2 + $0x40] ss:$8 sps:$4 sm:$0xff]  }
  0x2d   : > { %v391_v13 = vpack.c.bf16 %v381_v8, %v381_v8  ;;  %v4065_v26 = vld [vmem:[#allocation2 + $0x44] ss:$8 sps:$4 sm:$0xff]   ;;  %v4066_v28 = vld [vmem:[#allocation2 + $0xc0] ss:$8 sps:$4 sm:$0xff]   ;;  %v4071_v29 = vld [vmem:[#allocation2 + $0x34] ss:$8 sps:$4 sm:$0xff]  }
  0x2e   : > { %v4074_v30 = vld [vmem:[#allocation2 + $0xb4] ss:$8 sps:$4 sm:$0xff]   ;;  %v4072_v31 = vld [vmem:[#allocation2 + $0xb0] ss:$8 sps:$4 sm:$0xff]   ;;  %v4080_v33 = vld [vmem:[#allocation2 + $0xa4] ss:$8 sps:$4 sm:$0xff]  }
  0x2f   : > { %3927 = vmatpush3.bf16.msra.mxu0 %v4041_v5  ;;  %3939 = vmatpush3.bf16.msra.mxu1 %v4042_v6  ;;  %v4069_v32 = vld [vmem:[#allocation2 + $0x30] ss:$8 sps:$4 sm:$0xff]   ;;  %v4077_v34 = vld [vmem:[#allocation2 + $0x24] ss:$8 sps:$4 sm:$0xff]   ;;  %v4078_v35 = vld [vmem:[#allocation2 + $0xa0] ss:$8 sps:$4 sm:$0xff]  }
  0x30   : > { %3928 = vmatprep.subr.bf16.mxu0 %v4620_v0  ;;  %3940 = vmatprep.subr.bf16.mxu1 %v4620_v0  ;;  %v4075_v36 = vld [vmem:[#allocation2 + $0x20] ss:$8 sps:$4 sm:$0xff]   ;;  %v4086_v37 = vld [vmem:[#allocation2 + $0x94] ss:$8 sps:$4 sm:$0xff]   ;;  %v4084_v39 = vld [vmem:[#allocation2 + $0x90] ss:$8 sps:$4 sm:$0xff]  }
  0x31   : > { %v4083_v38 = vld [vmem:[#allocation2 + $0x14] ss:$8 sps:$4 sm:$0xff]   ;;  %v4081_v40 = vld [vmem:[#allocation2 + $0x10] ss:$8 sps:$4 sm:$0xff]   ;;  %v4089_v41 = vld [vmem:[#allocation2 + $0x4] ss:$8 sps:$4 sm:$0xff]  }
  0x32   : > { %v4087_v42 = vld [vmem:[#allocation2] ss:$8 sps:$4 sm:$0xff]   ;;  %v4092_v43 = vld [vmem:[#allocation2 + $0x84] ss:$8 sps:$4 sm:$0xff]   ;;  %v4095_v58 = vld [vmem:[%s5267_s3 + $0x74] ss:$8 sps:$4 sm:$0xff]  }
  0x33   : > { %3929 = vmatpush3.bf16.msra.mxu0 %v4043_v9  ;;  %3941 = vmatpush3.bf16.msra.mxu1 %v4044_v10  ;;  %v4090_v44 = vld [vmem:[#allocation2 + $0x80] ss:$8 sps:$4 sm:$0xff]   ;;  %v4093_v59 = vld [vmem:[%s5267_s3 + $0x70] ss:$8 sps:$4 sm:$0xff]   ;;  %v4098_v60 = vld [vmem:[%s5267_s3 + $0x64] ss:$8 sps:$4 sm:$0xff]  }
  0x34   : > { %643 = vmatprep.subr.bf16.mxu0 %v4050_v11  ;;  %764 = vmatprep.subr.bf16.mxu1 %v4047_v12  ;;  %v4096_v61 = vld [vmem:[%s5267_s3 + $0x60] ss:$8 sps:$4 sm:$0xff]   ;;  %v4101_v62 = vld [vmem:[%s5267_s3 + $0x54] ss:$8 sps:$4 sm:$0xff]   ;;  %v4099_v63 = vld [vmem:[%s5267_s3 + $0x50] ss:$8 sps:$4 sm:$0xff]  }
  0x35   : > { %v4104_v1 = vld [vmem:[%s5267_s3 + $0x44] ss:$8 sps:$4 sm:$0xff]   ;;  %v4102_v2 = vld [vmem:[%s5267_s3 + $0x40] ss:$8 sps:$4 sm:$0xff]   ;;  %v4105_v3 = vld [vmem:[%s5267_s3 + $0x30] ss:$8 sps:$4 sm:$0xff]  }
  0x36   : > { %3931 = vmatmul.mubr.msk.bf16.vlgmr.msra.gmra.mxu0 %vm416_vm1, %v391_v13  ;;  %3943 = vmatmul.mubr.msk.bf16.vlgmr.msra.gmra.mxu1 %vm416_vm1, %v380_v14  ;;  %v4107_v4 = vld [vmem:[%s5267_s3 + $0x34] ss:$8 sps:$4 sm:$0xff]   ;;  %v4110_v5 = vld [vmem:[%s5267_s3 + $0x24] ss:$8 sps:$4 sm:$0xff]   ;;  %v4108_v6 = vld [vmem:[%s5267_s3 + $0x20] ss:$8 sps:$4 sm:$0xff]  }
  0x37   : > { %644 = vmatpush1.bf16.msra.mxu0 %v4048_v16  ;;  %765 = vmatpush1.bf16.msra.mxu1 %v4045_v15  ;;  %v4113_v7 = vld [vmem:[%s5267_s3 + $0x14] ss:$8 sps:$4 sm:$0xff]   ;;  %v4111_v8 = vld [vmem:[%s5267_s3 + $0x10] ss:$8 sps:$4 sm:$0xff]   ;;  %v4116_v9 = vld [vmem:[%s5267_s3 + $0x4] ss:$8 sps:$4 sm:$0xff]  }
  0x38   : > { %645 = vmatprep.subr.bf16.mxu0 %v4056_v17  ;;  %766 = vmatprep.subr.bf16.mxu1 %v4053_v18  ;;  %v4114_v10 = vld [vmem:[%s5267_s3] ss:$8 sps:$4 sm:$0xff]   ;;  %v4119_v11 = vld [vmem:[#allocation2 + $0x174] ss:$8 sps:$4 sm:$0xff]   ;;  %v4120_v12 = vld [vmem:[#allocation2 + $0x1f0] ss:$8 sps:$4 sm:$0xff]  }
  0x39   : > { %796 = vmatprep.mubr.bf16.mxu1 %v4622_v45  ;;  %675 = vmatprep.mubr.bf16.mxu0 %v4622_v45  ;;  %v4122_v13 = vld [vmem:[#allocation2 + $0x1f4] ss:$8 sps:$4 sm:$0xff]   ;;  %v4126_v14 = vld [vmem:[#allocation2 + $0x1e0] ss:$8 sps:$4 sm:$0xff]   ;;  %v4128_v15 = vld [vmem:[#allocation2 + $0x1e4] ss:$8 sps:$4 sm:$0xff]  }
  0x3a   : > { %v4132_v16 = vld [vmem:[#allocation2 + $0x1d0] ss:$8 sps:$4 sm:$0xff]   ;;  %v4134_v17 = vld [vmem:[#allocation2 + $0x1d4] ss:$8 sps:$4 sm:$0xff]   ;;  %v4138_v18 = vld [vmem:[#allocation2 + $0x1c0] ss:$8 sps:$4 sm:$0xff]  }
  0x3b   : > { %646 = vmatpush1.bf16.msra.mxu0 %v4054_v20  ;;  %767 = vmatpush1.bf16.msra.mxu1 %v4051_v19  ;;  %v4140_v19 = vld [vmem:[#allocation2 + $0x1c4] ss:$8 sps:$4 sm:$0xff]   ;;  %v4144_v20 = vld [vmem:[#allocation2 + $0x1b0] ss:$8 sps:$4 sm:$0xff]   ;;  %s3383_s17 = scalar_lea.sflag [#allocation4], %s363_s11  ;;  %s4551_s28 = scalar_lea.vmem %s5224_s25, 128 }
  0x3c   : > { %647 = vmatprep.subr.bf16.mxu0 %v4062_v21  ;;  %768 = vmatprep.subr.bf16.mxu1 %v4059_v22  ;;  %v4146_v21 = vld [vmem:[#allocation2 + $0x1b4] ss:$8 sps:$4 sm:$0xff]   ;;  %v4150_v22 = vld [vmem:[#allocation2 + $0x1a0] ss:$8 sps:$4 sm:$0xff]   ;;  %p4552_p8 = scmp.ne.s32.totalorder %s5224_s25, %s4551_s28  ;;  %s4623_s30 = smov [#allocation5]  }
  0x3d   : > { %s4555_s29 = sshll.u32 %s4623_s30, 4  ;;  %s4556_s29 = int_to_ptr.vmem [resolvable:$false] %s4555_s29 }
  0x3e   : > { %p4553_p9 = pnand %p4552_p8, %p4717_p5  ;;  %s4557_s12 = scalar_lea.vmem %s4556_s29, 256 }
  0x3f   : > { %648 = vmatpush1.bf16.msra.mxu0 %v4060_v24  ;;  %769 = vmatpush1.bf16.msra.mxu1 %v4057_v23  ;;  %v4152_v23 = vld [vmem:[#allocation2 + $0x1a4] ss:$8 sps:$4 sm:$0xff]   ;;  %p4558_p11 = scmp.lt.s32.totalorder %s5224_s25, %s4556_s29  ;;  %p4559_p12 = scmp.lt.s32.totalorder %s4557_s12, %s4551_s28 }
  0x40   : > { %649 = vmatprep.subr.bf16.mxu0 %v4068_v25  ;;  %770 = vmatprep.subr.bf16.mxu1 %v4065_v26  ;;  %p4554_p10 = pneg %p4553_p9 }
  0x41   : > { %p4560_p13 = por %p4559_p12, %p4558_p11 }
  0x43   : > { %650 = vmatpush1.bf16.msra.mxu0 %v4066_v28  ;;  %771 = vmatpush1.bf16.msra.mxu1 %v4063_v27  ;;  %p4561_p0 = pnand %p4560_p13, %p4554_p10 }
  0x44   : > { %651 = vmatprep.subr.bf16.mxu0 %v4074_v30  ;;  %772 = vmatprep.subr.bf16.mxu1 %v4071_v29 }
  0x47   : > { %652 = vmatpush1.bf16.msra.mxu0 %v4072_v31  ;;  %773 = vmatpush1.bf16.msra.mxu1 %v4069_v32 }
  0x48   : > { %653 = vmatprep.subr.bf16.mxu0 %v4080_v33  ;;  %774 = vmatprep.subr.bf16.mxu1 %v4077_v34 }
  0x4b   : > { %654 = vmatpush1.bf16.msra.mxu0 %v4078_v35  ;;  %775 = vmatpush1.bf16.msra.mxu1 %v4075_v36 }
  0x4c   : > { %655 = vmatprep.subr.bf16.mxu0 %v4086_v37  ;;  %776 = vmatprep.subr.bf16.mxu1 %v4083_v38 }
  0x4f   : > { %656 = vmatpush1.bf16.msra.mxu0 %v4084_v39  ;;  %777 = vmatpush1.bf16.msra.mxu1 %v4081_v40  ;;  %v4117_v40 = vld [vmem:[#allocation2 + $0x170] ss:$8 sps:$4 sm:$0xff]  }
  0x50   : > { %778 = vmatprep.subr.bf16.mxu1 %v4089_v41  ;;  %657 = vmatprep.subr.bf16.mxu0 %v4092_v43  ;;  %v4123_v43 = vld [vmem:[#allocation2 + $0x160] ss:$8 sps:$4 sm:$0xff]  }
  0x53   : > { %779 = vmatpush1.bf16.msra.mxu1 %v4087_v42  ;;  %658 = vmatpush1.bf16.msra.mxu0 %v4090_v44  ;;  %v4125_v42 = vld [vmem:[#allocation2 + $0x164] ss:$8 sps:$4 sm:$0xff]   ;;  %v4131_v44 = vld [vmem:[#allocation2 + $0x154] ss:$8 sps:$4 sm:$0xff]  }
  0x54   : > { %910 = vmatprep.subr.bf16.mxu0 %v4095_v58  ;;  %1078 = vmatprep.subr.bf16.mxu1 %v4122_v13  ;;  %v4161_v58 = vld [vmem:[#allocation2 + $0x104] ss:$8 sps:$4 sm:$0xff]   ;;  %v4171_v13 = vld [vmem:[%s5267_s3 + $0xd0] ss:$8 sps:$4 sm:$0xff]  }
  0xf6   : > { %v454_v46 = vpop.f32.mrf.mxu0  ;;  %v521_v47 = vpop.f32.mrf.mxu1 }
  0xf7   : > { %v4790_v48 = vadd.f32 %v521_v47, %v454_v46  ;;  %v4129_v46 = vld [vmem:[#allocation2 + $0x150] ss:$8 sps:$4 sm:$0xff]   ;;  %v4137_v47 = vld [vmem:[#allocation2 + $0x144] ss:$8 sps:$4 sm:$0xff]  }
  0xf8   : > { %v3932_v49 = vpop.f32.mrf.mxu0  ;;  %v3944_v50 = vpop.f32.mrf.mxu1 }
  0xf9   : > { %v543_v51 = vpack.c.bf16 %v4790_v48, %v4790_v48  ;;  %v544_v52 = vrot.slane %v4790_v48, 7  ;;  %v4135_v49 = vld [vmem:[#allocation2 + $0x140] ss:$8 sps:$4 sm:$0xff]   ;;  %v4143_v50 = vld [vmem:[#allocation2 + $0x134] ss:$8 sps:$4 sm:$0xff]  }
  0xfa   : > { %v457_v53 = vpop.f32.mrf.mxu0  ;;  %v524_v54 = vpop.f32.mrf.mxu1 }
  0xfb   : > { %v562_v55 = vpack.c.bf16 %v544_v52, %v544_v52  ;;  %797 = vmatmul.mubr.bf16.vlgmr.msra.gmra.mxu1 %v543_v51  ;;  %v4141_v51 = vld [vmem:[#allocation2 + $0x130] ss:$8 sps:$4 sm:$0xff]   ;;  %v4149_v52 = vld [vmem:[#allocation2 + $0x124] ss:$8 sps:$4 sm:$0xff]   ;;  %v4147_v53 = vld [vmem:[#allocation2 + $0x120] ss:$8 sps:$4 sm:$0xff]  }
  0xfc   : > { %v3933_v56 = vpop.f32.mrf.mxu0  ;;  %v3945_v57 = vpop.f32.mrf.mxu1  ;;  %1110 = vmatprep.mubr.bf16.mxu1 %v4622_v45  ;;  %1079 = vmatpush1.bf16.msra.mxu1 %v4120_v12  ;;  %v4155_v54 = vld [vmem:[#allocation2 + $0x114] ss:$8 sps:$4 sm:$0xff]  }
  0xfd   : > { %676 = vmatmul.mubr.bf16.vlgmr.msra.gmra.mxu0 %v562_v55  ;;  %1080 = vmatprep.subr.bf16.mxu1 %v4128_v15  ;;  %v4153_v55 = vld [vmem:[#allocation2 + $0x110] ss:$8 sps:$4 sm:$0xff]   ;;  %v4158_v56 = vld [vmem:[#allocation2 + $0x194] ss:$8 sps:$4 sm:$0xff]   ;;  %v4174_v15 = vld [vmem:[%s5267_s3 + $0xc0] ss:$8 sps:$4 sm:$0xff]  }
  0xfe   : > { %942 = vmatprep.mubr.bf16.mxu0 %v4622_v45  ;;  %911 = vmatpush1.bf16.msra.mxu0 %v4093_v59  ;;  %v4156_v57 = vld [vmem:[#allocation2 + $0x190] ss:$8 sps:$4 sm:$0xff]   ;;  %v4159_v59 = vld [vmem:[#allocation2 + $0x100] ss:$8 sps:$4 sm:$0xff]   ;;  %v4173_v12 = vld [vmem:[%s5267_s3 + $0xd4] ss:$8 sps:$4 sm:$0xff]  }
  0xff   : > { %912 = vmatprep.subr.bf16.mxu0 %v4098_v60  ;;  %v4164_v60 = vld [vmem:[#allocation2 + $0x184] ss:$8 sps:$4 sm:$0xff]  }
 0x100   : > { %1081 = vmatpush1.bf16.msra.mxu1 %v4126_v14  ;;  %v4176_v14 = vld [vmem:[%s5267_s3 + $0xc4] ss:$8 sps:$4 sm:$0xff]  }
 0x101   : > { %1082 = vmatprep.subr.bf16.mxu1 %v4134_v17  ;;  %v4179_v17 = vld [vmem:[%s5267_s3 + $0xb4] ss:$8 sps:$4 sm:$0xff]  }
 0x102   : > { %913 = vmatpush1.bf16.msra.mxu0 %v4096_v61  ;;  %v4162_v61 = vld [vmem:[#allocation2 + $0x180] ss:$8 sps:$4 sm:$0xff]  }
 0x103   : > { %914 = vmatprep.subr.bf16.mxu0 %v4101_v62  ;;  %v3542_v62 = vld [vmem:[%s5268_s4] ss:$0 sm:$0xff] }
 0x104   : > { %1083 = vmatpush1.bf16.msra.mxu1 %v4132_v16  ;;  %v4177_v16 = vld [vmem:[%s5267_s3 + $0xb0] ss:$8 sps:$4 sm:$0xff]  }
 0x105   : > { %1084 = vmatprep.subr.bf16.mxu1 %v4140_v19  ;;  %v4180_v19 = vld [vmem:[%s5267_s3 + $0xa0] ss:$8 sps:$4 sm:$0xff]  }
 0x106   : > { %915 = vmatpush1.bf16.msra.mxu0 %v4099_v63 }
 0x107   : > { %916 = vmatprep.subr.bf16.mxu0 %v4104_v1 }
 0x108   : > { %1085 = vmatpush1.bf16.msra.mxu1 %v4138_v18  ;;  %v4182_v18 = vld [vmem:[%s5267_s3 + $0xa4] ss:$8 sps:$4 sm:$0xff]  }
 0x109   : > { %1086 = vmatprep.subr.bf16.mxu1 %v4146_v21  ;;  %v4183_v21 = vld [vmem:[%s5267_s3 + $0x90] ss:$8 sps:$4 sm:$0xff]  }
 0x10a   : > { %917 = vmatpush1.bf16.msra.mxu0 %v4102_v2 }
 0x10b   : > { %918 = vmatprep.subr.bf16.mxu0 %v4107_v4 }
 0x10c   : > { %1087 = vmatpush1.bf16.msra.mxu1 %v4144_v20  ;;  %v4185_v20 = vld [vmem:[%s5267_s3 + $0x94] ss:$8 sps:$4 sm:$0xff]  }
 0x10d   : > { %1088 = vmatprep.subr.bf16.mxu1 %v4152_v23  ;;  %v4186_v23 = vld [vmem:[%s5267_s3 + $0x80] ss:$8 sps:$4 sm:$0xff]  }
 0x10e   : > { %919 = vmatpush1.bf16.msra.mxu0 %v4105_v3 }
 0x10f   : > { %920 = vmatprep.subr.bf16.mxu0 %v4110_v5 }
 0x110   : > { %1089 = vmatpush1.bf16.msra.mxu1 %v4150_v22  ;;  %v4188_v22 = vld [vmem:[%s5267_s3 + $0x84] ss:$8 sps:$4 sm:$0xff]  }
 0x111   : > { %1090 = vmatprep.subr.bf16.mxu1 %v4158_v56 }
 0x112   : > { %921 = vmatpush1.bf16.msra.mxu0 %v4108_v6 }
 0x113   : > { %922 = vmatprep.subr.bf16.mxu0 %v4113_v7 }
 0x114   : > { %1091 = vmatpush1.bf16.msra.mxu1 %v4156_v57  ;;  %v4197_v57 = vld [vmem:[#allocation2 + $0x264] ss:$8 sps:$4 sm:$0xff]  }
 0x115   : > { %1092 = vmatprep.subr.bf16.mxu1 %v4164_v60  ;;  %v4201_v60 = vld [vmem:[#allocation2 + $0x250] ss:$8 sps:$4 sm:$0xff]  }
 0x116   : > { %923 = vmatpush1.bf16.msra.mxu0 %v4111_v8 }
 0x117   : > { %924 = vmatprep.subr.bf16.mxu0 %v4116_v9  ;;  %v4167_v9 = vld [vmem:[%s5267_s3 + $0xf4] ss:$8 sps:$4 sm:$0xff]  }
 0x118   : > { %1093 = vmatpush1.bf16.msra.mxu1 %v4162_v61  ;;  %v4209_v61 = vld [vmem:[#allocation2 + $0x244] ss:$8 sps:$4 sm:$0xff]  }
 0x119   : > { %1346 = vmatprep.subr.bf16.mxu1 %v4167_v9  ;;  %v4228_v9 = vld [vmem:[#allocation2 + $0x290] ss:$8 sps:$4 sm:$0xff]  }
 0x11a   : > { %925 = vmatpush1.bf16.msra.mxu0 %v4114_v10  ;;  %v4170_v10 = vld [vmem:[%s5267_s3 + $0xe4] ss:$8 sps:$4 sm:$0xff]  }
 0x11b   : > { %1199 = vmatprep.subr.bf16.mxu0 %v4119_v11  ;;  %v4168_v11 = vld [vmem:[%s5267_s3 + $0xe0] ss:$8 sps:$4 sm:$0xff]  }
 0x1bb   : > { %v798_v24 = vpop.f32.mrf.mxu1 }
 0x1bd   : > { %v677_v25 = vpop.f32.mrf.mxu0  ;;  %v800_v26 = vpop.f32.mrf.mxu1 }
 0x1be   : > { %v799_v34 = vadd.f32 %v798_v24, %v677_v25  ;;  %v4191_v24 = vld [vmem:[#allocation2 + $0x274] ss:$8 sps:$4 sm:$0xff]   ;;  %v4192_v25 = vld [vmem:[#allocation2 + $0x2f0] ss:$8 sps:$4 sm:$0xff]  }
 0x1bf   : > { %v679_v27 = vpop.f32.mrf.mxu0  ;;  %v802_v28 = vpop.f32.mrf.mxu1 }
 0x1c0   : > { %v801_v29 = vadd.f32 %v800_v26, %v679_v27  ;;  %v4194_v26 = vld [vmem:[#allocation2 + $0x2f4] ss:$8 sps:$4 sm:$0xff]   ;;  %v4198_v27 = vld [vmem:[#allocation2 + $0x2e0] ss:$8 sps:$4 sm:$0xff]   ;;  %v4200_v28 = vld [vmem:[#allocation2 + $0x2e4] ss:$8 sps:$4 sm:$0xff]  }
 0x1c1   : > { %v681_v30 = vpop.f32.mrf.mxu0  ;;  %v803_v31 = vpop.f32.mrf.mxu1 }
 0x1c2   : > { %v3525_v32 = vmul.f32 -1.442695, %v801_v29  ;;  %v4204_v29 = vld [vmem:[#allocation2 + $0x2d0] ss:$8 sps:$4 sm:$0xff]   ;;  %v4206_v30 = vld [vmem:[#allocation2 + $0x2d4] ss:$8 sps:$4 sm:$0xff]  }
 0x1c3   : > { %v682_v33 = vpop.f32.mrf.mxu0  ;;  %v4210_v31 = vld [vmem:[#allocation2 + $0x2c0] ss:$8 sps:$4 sm:$0xff]  }
 0x1c4   : > { %4489 = vpow2.f32 %v3525_v32  ;;  %v4212_v32 = vld [vmem:[#allocation2 + $0x2c4] ss:$8 sps:$4 sm:$0xff]   ;;  %v4216_v33 = vld [vmem:[#allocation2 + $0x2b0] ss:$8 sps:$4 sm:$0xff]  }
 0x1c5   : > { %4491 = vtanh.f32 %v799_v34  ;;  %v4218_v34 = vld [vmem:[#allocation2 + $0x2b4] ss:$8 sps:$4 sm:$0xff]  }
 0x1d1   : > { %v4490_v35 = vpop.eup %4489 }
 0x1d2   : > { %v809_v36 = vadd.f32 1.0, %v4490_v35  ;;  %v4492_v37 = vpop.eup %4491  ;;  %v4222_v35 = vld [vmem:[#allocation2 + $0x2a0] ss:$8 sps:$4 sm:$0xff]  }
 0x1d4   : > { %4493 = vrcp.f32 %v809_v36  ;;  %v4224_v36 = vld [vmem:[#allocation2 + $0x2a4] ss:$8 sps:$4 sm:$0xff]  }
 0x1e1   : > { %v4494_v38 = vpop.eup %4493 }
 0x1e2   : > { %v812_v39 = vmul.f32 %v4494_v38, %v4492_v37 }
 0x1e4   : > { %v829_v41 = vpack.c.bf16 %v812_v39, %v812_v39 }
 0x1e6   : > { %943 = vmatmul.mubr.bf16.vlgmr.msra.gmra.mxu0 %v829_v41 }
 0x1e7   : > { %1200 = vmatpush1.bf16.msra.mxu0 %v4117_v40  ;;  %1231 = vmatprep.mubr.bf16.mxu0 %v4622_v45 }
 0x1e8   : > { %1201 = vmatprep.subr.bf16.mxu0 %v4125_v42 }
 0x1eb   : > { %1202 = vmatpush1.bf16.msra.mxu0 %v4123_v43 }
 0x1ec   : > { %1203 = vmatprep.subr.bf16.mxu0 %v4131_v44 }
 0x1ef   : > { %1204 = vmatpush1.bf16.msra.mxu0 %v4129_v46 }
 0x1f0   : > { %1205 = vmatprep.subr.bf16.mxu0 %v4137_v47 }
 0x1f3   : > { %1206 = vmatpush1.bf16.msra.mxu0 %v4135_v49 }
 0x1f4   : > { %1207 = vmatprep.subr.bf16.mxu0 %v4143_v50 }
 0x1f7   : > { %1208 = vmatpush1.bf16.msra.mxu0 %v4141_v51 }
 0x1f8   : > { %1209 = vmatprep.subr.bf16.mxu0 %v4149_v52 }
 0x1fb   : > { %1210 = vmatpush1.bf16.msra.mxu0 %v4147_v53 }
 0x1fc   : > { %1211 = vmatprep.subr.bf16.mxu0 %v4155_v54 }
 0x1ff   : > { %1212 = vmatpush1.bf16.msra.mxu0 %v4153_v55  ;;  %v4189_v55 = vld [vmem:[#allocation2 + $0x270] ss:$8 sps:$4 sm:$0xff]  }
 0x200   : > { %1213 = vmatprep.subr.bf16.mxu0 %v4161_v58  ;;  %v4195_v58 = vld [vmem:[#allocation2 + $0x260] ss:$8 sps:$4 sm:$0xff]  }
 0x203   : > { %1214 = vmatpush1.bf16.msra.mxu0 %v4159_v59  ;;  %v4203_v59 = vld [vmem:[#allocation2 + $0x254] ss:$8 sps:$4 sm:$0xff]  }
 0x204   : > { %1515 = vmatprep.subr.bf16.mxu0 %v4194_v26  ;;  %v4245_v26 = vld [vmem:[%s5267_s3 + $0x154] ss:$8 sps:$4 sm:$0xff]  }
 0x2a6   : > { %v944_v63 = vpop.f32.mrf.mxu0 }
 0x2a7   : > { %v958_v1 = vadd.f32 %v3542_v62, %v944_v63  ;;  %v4207_v62 = vld [vmem:[#allocation2 + $0x240] ss:$8 sps:$4 sm:$0xff]   ;;  %v4215_v63 = vld [vmem:[#allocation2 + $0x234] ss:$8 sps:$4 sm:$0xff]  }
 0x2a8   : > { %v4849_v2 = vpop.f32.mrf.mxu0 }
 0x2a9   : > { %v4852_v3 = vadd.f32 %v958_v1, %v4790_v48  ;;  %v4165_v48 = vld [vmem:[%s5267_s3 + $0xf0] ss:$8 sps:$4 sm:$0xff]  }
 0x2aa   : > { %v948_v4 = vpop.f32.mrf.mxu0  ;;  %v4213_v1 = vld [vmem:[#allocation2 + $0x230] ss:$8 sps:$4 sm:$0xff]  }
 0x2ab   : > { %v978_v5 = vpack.c.bf16 %v4852_v3, %v4852_v3  ;;  %v979_v6 = vrot.slane %v4852_v3, 7  ;;  %v4221_v4 = vld [vmem:[#allocation2 + $0x224] ss:$8 sps:$4 sm:$0xff]  }
 0x2ac   : > { %v949_v7 = vpop.f32.mrf.mxu0 }
 0x2ad   : > { %1232 = vmatmul.mubr.bf16.vlgmr.msra.gmra.mxu0 %v978_v5  ;;  %v997_v8 = vpack.c.bf16 %v979_v6, %v979_v6  ;;  %v4219_v5 = vld [vmem:[#allocation2 + $0x220] ss:$8 sps:$4 sm:$0xff]   ;;  %v4227_v6 = vld [vmem:[#allocation2 + $0x214] ss:$8 sps:$4 sm:$0xff]   ;;  %v4225_v7 = vld [vmem:[#allocation2 + $0x210] ss:$8 sps:$4 sm:$0xff]  }
 0x2ae   : > { %1547 = vmatprep.mubr.bf16.mxu0 %v4622_v45  ;;  %1516 = vmatpush1.bf16.msra.mxu0 %v4192_v25  ;;  %v4240_v25 = vld [vmem:[%s5267_s3 + $0x160] ss:$8 sps:$4 sm:$0xff]  }
 0x2af   : > { %1111 = vmatmul.mubr.bf16.vlgmr.msra.gmra.mxu1 %v997_v8  ;;  %1517 = vmatprep.subr.bf16.mxu0 %v4200_v28  ;;  %v4230_v8 = vld [vmem:[#allocation2 + $0x294] ss:$8 sps:$4 sm:$0xff]   ;;  %v4248_v28 = vld [vmem:[%s5267_s3 + $0x144] ss:$8 sps:$4 sm:$0xff]  }
 0x2b0   : > { %1378 = vmatprep.mubr.bf16.mxu1 %v4622_v45  ;;  %1347 = vmatpush1.bf16.msra.mxu1 %v4165_v48  ;;  %v4233_v48 = vld [vmem:[#allocation2 + $0x204] ss:$8 sps:$4 sm:$0xff]  }
 0x2b1   : > { %1348 = vmatprep.subr.bf16.mxu1 %v4170_v10  ;;  %v4231_v10 = vld [vmem:[#allocation2 + $0x200] ss:$8 sps:$4 sm:$0xff]  }
 0x2b2   : > { %1518 = vmatpush1.bf16.msra.mxu0 %v4198_v27  ;;  %v4243_v27 = vld [vmem:[%s5267_s3 + $0x150] ss:$8 sps:$4 sm:$0xff]  }
 0x2b3   : > { %1519 = vmatprep.subr.bf16.mxu0 %v4206_v30  ;;  %v4249_v30 = vld [vmem:[%s5267_s3 + $0x130] ss:$8 sps:$4 sm:$0xff]  }
 0x2b4   : > { %1349 = vmatpush1.bf16.msra.mxu1 %v4168_v11  ;;  %v4236_v11 = vld [vmem:[#allocation2 + $0x284] ss:$8 sps:$4 sm:$0xff]  }
 0x2b5   : > { %1350 = vmatprep.subr.bf16.mxu1 %v4173_v12  ;;  %v4234_v12 = vld [vmem:[#allocation2 + $0x280] ss:$8 sps:$4 sm:$0xff]  }
 0x2b6   : > { %1520 = vmatpush1.bf16.msra.mxu0 %v4204_v29  ;;  %v4246_v29 = vld [vmem:[%s5267_s3 + $0x140] ss:$8 sps:$4 sm:$0xff]  }
 0x2b7   : > { %1521 = vmatprep.subr.bf16.mxu0 %v4212_v32  ;;  %v4254_v32 = vld [vmem:[%s5267_s3 + $0x124] ss:$8 sps:$4 sm:$0xff]  }
 0x2b8   : > { %1351 = vmatpush1.bf16.msra.mxu1 %v4171_v13  ;;  %v3609_v13 = vld [vmem:[%s5268_s4 + $0x1] ss:$0 sm:$0xff] }
 0x2b9   : > { %1352 = vmatprep.subr.bf16.mxu1 %v4176_v14 }
 0x2ba   : > { %1522 = vmatpush1.bf16.msra.mxu0 %v4210_v31  ;;  %v4251_v31 = vld [vmem:[%s5267_s3 + $0x134] ss:$8 sps:$4 sm:$0xff]  }
 0x2bb   : > { %1523 = vmatprep.subr.bf16.mxu0 %v4218_v34  ;;  %v4257_v34 = vld [vmem:[%s5267_s3 + $0x114] ss:$8 sps:$4 sm:$0xff]  }
 0x2bc   : > { %1353 = vmatpush1.bf16.msra.mxu1 %v4174_v15 }
 0x2bd   : > { %1354 = vmatprep.subr.bf16.mxu1 %v4179_v17 }
 0x2be   : > { %1524 = vmatpush1.bf16.msra.mxu0 %v4216_v33  ;;  %v4252_v33 = vld [vmem:[%s5267_s3 + $0x120] ss:$8 sps:$4 sm:$0xff]  }
 0x2bf   : > { %1525 = vmatprep.subr.bf16.mxu0 %v4224_v36  ;;  %v4260_v36 = vld [vmem:[%s5267_s3 + $0x104] ss:$8 sps:$4 sm:$0xff]  }
 0x2c0   : > { %1355 = vmatpush1.bf16.msra.mxu1 %v4177_v16 }
 0x2c1   : > { %1356 = vmatprep.subr.bf16.mxu1 %v4182_v18 }
 0x2c2   : > { %1526 = vmatpush1.bf16.msra.mxu0 %v4222_v35  ;;  %v4255_v35 = vld [vmem:[%s5267_s3 + $0x110] ss:$8 sps:$4 sm:$0xff]  }
 0x2c3   : > { %1527 = vmatprep.subr.bf16.mxu0 %v4230_v8  ;;  %v4261_v8 = vld [vmem:[#allocation2 + $0x370] ss:$8 sps:$4 sm:$0xff]  }
 0x2c4   : > { %1357 = vmatpush1.bf16.msra.mxu1 %v4180_v19 }
 0x2c5   : > { %1358 = vmatprep.subr.bf16.mxu1 %v4185_v20 }
 0x2c6   : > { %1528 = vmatpush1.bf16.msra.mxu0 %v4228_v9 }
 0x2c7   : > { %1529 = vmatprep.subr.bf16.mxu0 %v4236_v11  ;;  %v4275_v11 = vld [vmem:[#allocation2 + $0x354] ss:$8 sps:$4 sm:$0xff]  }
 0x2c8   : > { %1359 = vmatpush1.bf16.msra.mxu1 %v4183_v21 }
 0x2c9   : > { %1360 = vmatprep.subr.bf16.mxu1 %v4188_v22 }
 0x2ca   : > { %1530 = vmatpush1.bf16.msra.mxu0 %v4234_v12  ;;  %v4273_v12 = vld [vmem:[#allocation2 + $0x350] ss:$8 sps:$4 sm:$0xff]  }
 0x2cc   : > { %1361 = vmatpush1.bf16.msra.mxu1 %v4186_v23  ;;  %v4239_v23 = vld [vmem:[%s5267_s3 + $0x174] ss:$8 sps:$4 sm:$0xff]  }
 0x2cd   : > { %1636 = vmatprep.subr.bf16.mxu1 %v4191_v24  ;;  %1783 = vmatprep.subr.bf16.mxu0 %v4239_v23  ;;  %v4242_v24 = vld [vmem:[%s5267_s3 + $0x164] ss:$8 sps:$4 sm:$0xff]   ;;  %v4302_v23 = vld [vmem:[#allocation2 + $0x394] ss:$8 sps:$4 sm:$0xff]  }
 0x36d   : > { %v1233_v37 = vpop.f32.mrf.mxu0 }
 0x36f   : > { %v1112_v38 = vpop.f32.mrf.mxu1  ;;  %v1235_v39 = vpop.f32.mrf.mxu0 }
 0x370   : > { %v1234_v49 = vadd.f32 %v1233_v37, %v1112_v38  ;;  %v4258_v37 = vld [vmem:[%s5267_s3 + $0x100] ss:$8 sps:$4 sm:$0xff]   ;;  %v4263_v38 = vld [vmem:[#allocation2 + $0x374] ss:$8 sps:$4 sm:$0xff]  }
 0x371   : > { %v1114_v40 = vpop.f32.mrf.mxu1  ;;  %v1237_v41 = vpop.f32.mrf.mxu0 }
 0x372   : > { %v1236_v42 = vadd.f32 %v1235_v39, %v1114_v40  ;;  %v4264_v39 = vld [vmem:[#allocation2 + $0x3f0] ss:$8 sps:$4 sm:$0xff]   ;;  %v4266_v40 = vld [vmem:[#allocation2 + $0x3f4] ss:$8 sps:$4 sm:$0xff]   ;;  %v4270_v41 = vld [vmem:[#allocation2 + $0x3e0] ss:$8 sps:$4 sm:$0xff]  }
 0x373   : > { %v1116_v43 = vpop.f32.mrf.mxu1  ;;  %v1238_v44 = vpop.f32.mrf.mxu0 }
 0x374   : > { %v3575_v46 = vmul.f32 -1.442695, %v1236_v42  ;;  %v4272_v42 = vld [vmem:[#allocation2 + $0x3e4] ss:$8 sps:$4 sm:$0xff]   ;;  %v4276_v43 = vld [vmem:[#allocation2 + $0x3d0] ss:$8 sps:$4 sm:$0xff]  }
 0x375   : > { %v1117_v47 = vpop.f32.mrf.mxu1  ;;  %v4278_v44 = vld [vmem:[#allocation2 + $0x3d4] ss:$8 sps:$4 sm:$0xff]  }
 0x376   : > { %4495 = vpow2.f32 %v3575_v46  ;;  %v4282_v46 = vld [vmem:[#allocation2 + $0x3c0] ss:$8 sps:$4 sm:$0xff]   ;;  %v4284_v47 = vld [vmem:[#allocation2 + $0x3c4] ss:$8 sps:$4 sm:$0xff]  }
 0x377   : > { %4497 = vtanh.f32 %v1234_v49  ;;  %v4288_v49 = vld [vmem:[#allocation2 + $0x3b0] ss:$8 sps:$4 sm:$0xff]  }
 0x383   : > { %v4496_v50 = vpop.eup %4495 }
 0x384   : > { %v1244_v51 = vadd.f32 1.0, %v4496_v50  ;;  %v4498_v52 = vpop.eup %4497  ;;  %v4290_v50 = vld [vmem:[#allocation2 + $0x3b4] ss:$8 sps:$4 sm:$0xff]  }
 0x386   : > { %4499 = vrcp.f32 %v1244_v51  ;;  %v4294_v51 = vld [vmem:[#allocation2 + $0x3a0] ss:$8 sps:$4 sm:$0xff]  }
 0x393   : > { %v4500_v53 = vpop.eup %4499 }
 0x394   : > { %v1247_v54 = vmul.f32 %v4500_v53, %v4498_v52  ;;  %v4296_v52 = vld [vmem:[#allocation2 + $0x3a4] ss:$8 sps:$4 sm:$0xff]  }
 0x396   : > { %v1265_v56 = vpack.c.bf16 %v1247_v54, %v1247_v54 }
 0x398   : > { %1379 = vmatmul.mubr.bf16.vlgmr.msra.gmra.mxu1 %v1265_v56 }
 0x399   : > { %1637 = vmatpush1.bf16.msra.mxu1 %v4189_v55  ;;  %1668 = vmatprep.mubr.bf16.mxu1 %v4622_v45 }
 0x39a   : > { %1638 = vmatprep.subr.bf16.mxu1 %v4197_v57 }
 0x39d   : > { %1639 = vmatpush1.bf16.msra.mxu1 %v4195_v58 }
 0x39e   : > { %1640 = vmatprep.subr.bf16.mxu1 %v4203_v59 }
 0x3a1   : > { %1641 = vmatpush1.bf16.msra.mxu1 %v4201_v60 }
 0x3a2   : > { %1642 = vmatprep.subr.bf16.mxu1 %v4209_v61 }
 0x3a5   : > { %1643 = vmatpush1.bf16.msra.mxu1 %v4207_v62 }
 0x3a6   : > { %1644 = vmatprep.subr.bf16.mxu1 %v4215_v63 }
 0x3a9   : > { %1645 = vmatpush1.bf16.msra.mxu1 %v4213_v1 }
 0x3aa   : > { %1646 = vmatprep.subr.bf16.mxu1 %v4221_v4 }
 0x3ad   : > { %1647 = vmatpush1.bf16.msra.mxu1 %v4219_v5 }
 0x3ae   : > { %1648 = vmatprep.subr.bf16.mxu1 %v4227_v6 }
 0x3b1   : > { %1649 = vmatpush1.bf16.msra.mxu1 %v4225_v7 }
 0x3b2   : > { %1650 = vmatprep.subr.bf16.mxu1 %v4233_v48  ;;  %v4269_v48 = vld [vmem:[#allocation2 + $0x364] ss:$8 sps:$4 sm:$0xff]  }
 0x3b5   : > { %1651 = vmatpush1.bf16.msra.mxu1 %v4231_v10  ;;  %v4267_v10 = vld [vmem:[#allocation2 + $0x360] ss:$8 sps:$4 sm:$0xff]  }
 0x3b6   : > { %1952 = vmatprep.subr.bf16.mxu1 %v4266_v40  ;;  %v4312_v40 = vld [vmem:[%s5267_s3 + $0x1e0] ss:$8 sps:$4 sm:$0xff]  }
 0x458   : > { %v1380_v14 = vpop.f32.mrf.mxu1 }
 0x459   : > { %v1395_v15 = vadd.f32 %v3609_v13, %v1380_v14  ;;  %v4281_v13 = vld [vmem:[#allocation2 + $0x344] ss:$8 sps:$4 sm:$0xff]   ;;  %v4279_v14 = vld [vmem:[#allocation2 + $0x340] ss:$8 sps:$4 sm:$0xff]  }
 0x45a   : > { %v4911_v16 = vpop.f32.mrf.mxu1 }
 0x45b   : > { %v4914_v17 = vadd.f32 %v1395_v15, %v4852_v3  ;;  %v4237_v3 = vld [vmem:[%s5267_s3 + $0x170] ss:$8 sps:$4 sm:$0xff]   ;;  %v4287_v15 = vld [vmem:[#allocation2 + $0x334] ss:$8 sps:$4 sm:$0xff]  }
 0x45c   : > { %v1384_v18 = vpop.f32.mrf.mxu1 }
 0x45d   : > { %v1415_v19 = vpack.c.bf16 %v4914_v17, %v4914_v17  ;;  %v1416_v20 = vrot.slane %v4914_v17, 7  ;;  %v4285_v18 = vld [vmem:[#allocation2 + $0x330] ss:$8 sps:$4 sm:$0xff]  }
 0x45e   : > { %v1385_v21 = vpop.f32.mrf.mxu1 }
 0x45f   : > { %1669 = vmatmul.mubr.bf16.vlgmr.msra.gmra.mxu1 %v1415_v19  ;;  %v1434_v22 = vpack.c.bf16 %v1416_v20, %v1416_v20  ;;  %v4293_v19 = vld [vmem:[#allocation2 + $0x324] ss:$8 sps:$4 sm:$0xff]   ;;  %v4291_v20 = vld [vmem:[#allocation2 + $0x320] ss:$8 sps:$4 sm:$0xff]   ;;  %v4299_v21 = vld [vmem:[#allocation2 + $0x314] ss:$8 sps:$4 sm:$0xff]  }
 0x460   : > { %1984 = vmatprep.mubr.bf16.mxu1 %v4622_v45  ;;  %1953 = vmatpush1.bf16.msra.mxu1 %v4264_v39 }
 0x461   : > { %1548 = vmatmul.mubr.bf16.vlgmr.msra.gmra.mxu0 %v1434_v22  ;;  %1954 = vmatprep.subr.bf16.mxu1 %v4272_v42  ;;  %v4297_v22 = vld [vmem:[#allocation2 + $0x310] ss:$8 sps:$4 sm:$0xff]  }
 0x462   : > { %1815 = vmatprep.mubr.bf16.mxu0 %v4622_v45  ;;  %1784 = vmatpush1.bf16.msra.mxu0 %v4237_v3  ;;  %v4300_v3 = vld [vmem:[#allocation2 + $0x390] ss:$8 sps:$4 sm:$0xff]  }
 0x463   : > { %1785 = vmatprep.subr.bf16.mxu0 %v4242_v24  ;;  %v4305_v24 = vld [vmem:[#allocation2 + $0x304] ss:$8 sps:$4 sm:$0xff]   ;;  %v4315_v42 = vld [vmem:[%s5267_s3 + $0x1d0] ss:$8 sps:$4 sm:$0xff]  }
 0x464   : > { %1955 = vmatpush1.bf16.msra.mxu1 %v4270_v41  ;;  %v4317_v41 = vld [vmem:[%s5267_s3 + $0x1d4] ss:$8 sps:$4 sm:$0xff]  }
 0x465   : > { %1956 = vmatprep.subr.bf16.mxu1 %v4278_v44  ;;  %v4318_v44 = vld [vmem:[%s5267_s3 + $0x1c0] ss:$8 sps:$4 sm:$0xff]  }
 0x466   : > { %1786 = vmatpush1.bf16.msra.mxu0 %v4240_v25  ;;  %v4303_v25 = vld [vmem:[#allocation2 + $0x300] ss:$8 sps:$4 sm:$0xff]  }
 0x467   : > { %1787 = vmatprep.subr.bf16.mxu0 %v4245_v26  ;;  %v4308_v26 = vld [vmem:[#allocation2 + $0x384] ss:$8 sps:$4 sm:$0xff]  }
 0x468   : > { %1957 = vmatpush1.bf16.msra.mxu1 %v4276_v43  ;;  %v4320_v43 = vld [vmem:[%s5267_s3 + $0x1c4] ss:$8 sps:$4 sm:$0xff]  }
 0x469   : > { %1958 = vmatprep.subr.bf16.mxu1 %v4284_v47  ;;  %v4323_v47 = vld [vmem:[%s5267_s3 + $0x1b4] ss:$8 sps:$4 sm:$0xff]  }
 0x46a   : > { %1788 = vmatpush1.bf16.msra.mxu0 %v4243_v27  ;;  %v4306_v27 = vld [vmem:[#allocation2 + $0x380] ss:$8 sps:$4 sm:$0xff]  }
 0x46b   : > { %1789 = vmatprep.subr.bf16.mxu0 %v4248_v28  ;;  %v3676_v28 = vld [vmem:[%s5268_s4 + $0x2] ss:$0 sm:$0xff] }
 0x46c   : > { %1959 = vmatpush1.bf16.msra.mxu1 %v4282_v46  ;;  %v4321_v46 = vld [vmem:[%s5267_s3 + $0x1b0] ss:$8 sps:$4 sm:$0xff]  }
 0x46d   : > { %1960 = vmatprep.subr.bf16.mxu1 %v4290_v50  ;;  %v4324_v50 = vld [vmem:[%s5267_s3 + $0x1a0] ss:$8 sps:$4 sm:$0xff]  }
 0x46e   : > { %1790 = vmatpush1.bf16.msra.mxu0 %v4246_v29 }
 0x46f   : > { %1791 = vmatprep.subr.bf16.mxu0 %v4251_v31 }
 0x470   : > { %1961 = vmatpush1.bf16.msra.mxu1 %v4288_v49  ;;  %v4326_v49 = vld [vmem:[%s5267_s3 + $0x1a4] ss:$8 sps:$4 sm:$0xff]  }
 0x471   : > { %1962 = vmatprep.subr.bf16.mxu1 %v4296_v52  ;;  %v4327_v52 = vld [vmem:[%s5267_s3 + $0x190] ss:$8 sps:$4 sm:$0xff]  }
 0x472   : > { %1792 = vmatpush1.bf16.msra.mxu0 %v4249_v30  ;;  %v1397_v30 = vadd.f32 %v4911_v16, %v4849_v2  ;;  %v4311_v2 = vld [vmem:[%s5267_s3 + $0x1f4] ss:$8 sps:$4 sm:$0xff]   ;;  %v4309_v16 = vld [vmem:[%s5267_s3 + $0x1f0] ss:$8 sps:$4 sm:$0xff]  }
 0x473   : > { %1793 = vmatprep.subr.bf16.mxu0 %v4254_v32 }
 0x474   : > { %1963 = vmatpush1.bf16.msra.mxu1 %v4294_v51  ;;  %v4329_v51 = vld [vmem:[%s5267_s3 + $0x194] ss:$8 sps:$4 sm:$0xff]  }
 0x475   : > { %1964 = vmatprep.subr.bf16.mxu1 %v4302_v23 }
 0x476   : > { %1794 = vmatpush1.bf16.msra.mxu0 %v4252_v33 }
 0x477   : > { %1795 = vmatprep.subr.bf16.mxu0 %v4257_v34 }
 0x478   : > { %1965 = vmatpush1.bf16.msra.mxu1 %v4300_v3  ;;  %v4333_v3 = vld [vmem:[#allocation2 + $0x470] ss:$8 sps:$4 sm:$0xff]  }
 0x479   : > { %1966 = vmatprep.subr.bf16.mxu1 %v4308_v26  ;;  %v4339_v26 = vld [vmem:[#allocation2 + $0x460] ss:$8 sps:$4 sm:$0xff]  }
 0x47a   : > { %1796 = vmatpush1.bf16.msra.mxu0 %v4255_v35 }
 0x47b   : > { %1797 = vmatprep.subr.bf16.mxu0 %v4260_v36 }
 0x47c   : > { %1967 = vmatpush1.bf16.msra.mxu1 %v4306_v27  ;;  %v4347_v27 = vld [vmem:[#allocation2 + $0x454] ss:$8 sps:$4 sm:$0xff]  }
 0x47d   : > { %2220 = vmatprep.subr.bf16.mxu1 %v4311_v2  ;;  %v4372_v2 = vld [vmem:[#allocation2 + $0x490] ss:$8 sps:$4 sm:$0xff]  }
 0x47e   : > { %1798 = vmatpush1.bf16.msra.mxu0 %v4258_v37 }
 0x47f   : > { %2073 = vmatprep.subr.bf16.mxu0 %v4263_v38 }
 0x51f   : > { %v1670_v53 = vpop.f32.mrf.mxu1 }
 0x521   : > { %v1549_v54 = vpop.f32.mrf.mxu0  ;;  %v1672_v55 = vpop.f32.mrf.mxu1 }
 0x522   : > { %v1671_v63 = vadd.f32 %v1670_v53, %v1549_v54  ;;  %v4332_v53 = vld [vmem:[%s5267_s3 + $0x184] ss:$8 sps:$4 sm:$0xff]   ;;  %v4330_v54 = vld [vmem:[%s5267_s3 + $0x180] ss:$8 sps:$4 sm:$0xff]  }
 0x523   : > { %v1551_v56 = vpop.f32.mrf.mxu0  ;;  %v1674_v57 = vpop.f32.mrf.mxu1 }
 0x524   : > { %v1673_v58 = vadd.f32 %v1672_v55, %v1551_v56  ;;  %v4335_v55 = vld [vmem:[#allocation2 + $0x474] ss:$8 sps:$4 sm:$0xff]   ;;  %v4336_v56 = vld [vmem:[#allocation2 + $0x4f0] ss:$8 sps:$4 sm:$0xff]  }
 0x525   : > { %v1553_v59 = vpop.f32.mrf.mxu0  ;;  %v1675_v60 = vpop.f32.mrf.mxu1  ;;  %v4338_v57 = vld [vmem:[#allocation2 + $0x4f4] ss:$8 sps:$4 sm:$0xff]  }
 0x526   : > { %v3642_v61 = vmul.f32 -1.442695, %v1673_v58  ;;  %v4342_v58 = vld [vmem:[#allocation2 + $0x4e0] ss:$8 sps:$4 sm:$0xff]   ;;  %v4344_v59 = vld [vmem:[#allocation2 + $0x4e4] ss:$8 sps:$4 sm:$0xff]  }
 0x527   : > { %v1554_v62 = vpop.f32.mrf.mxu0  ;;  %v4348_v60 = vld [vmem:[#allocation2 + $0x4d0] ss:$8 sps:$4 sm:$0xff]  }
 0x528   : > { %4501 = vpow2.f32 %v3642_v61  ;;  %v4350_v61 = vld [vmem:[#allocation2 + $0x4d4] ss:$8 sps:$4 sm:$0xff]   ;;  %v4354_v62 = vld [vmem:[#allocation2 + $0x4c0] ss:$8 sps:$4 sm:$0xff]  }
 0x529   : > { %4503 = vtanh.f32 %v1671_v63  ;;  %v4356_v63 = vld [vmem:[#allocation2 + $0x4c4] ss:$8 sps:$4 sm:$0xff]  }
 0x535   : > { %v4502_v1 = vpop.eup %4501 }
 0x536   : > { %v1681_v4 = vadd.f32 1.0, %v4502_v1  ;;  %v4504_v5 = vpop.eup %4503  ;;  %v4360_v1 = vld [vmem:[#allocation2 + $0x4b0] ss:$8 sps:$4 sm:$0xff]  }
 0x538   : > { %4505 = vrcp.f32 %v1681_v4  ;;  %v4362_v4 = vld [vmem:[#allocation2 + $0x4b4] ss:$8 sps:$4 sm:$0xff]  }
 0x545   : > { %v4506_v6 = vpop.eup %4505 }
 0x546   : > { %v1684_v7 = vmul.f32 %v4506_v6, %v4504_v5  ;;  %v4366_v5 = vld [vmem:[#allocation2 + $0x4a0] ss:$8 sps:$4 sm:$0xff]   ;;  %v4368_v6 = vld [vmem:[#allocation2 + $0x4a4] ss:$8 sps:$4 sm:$0xff]  }
 0x548   : > { %v1702_v9 = vpack.c.bf16 %v1684_v7, %v1684_v7 }
 0x54a   : > { %1816 = vmatmul.mubr.bf16.vlgmr.msra.gmra.mxu0 %v1702_v9 }
 0x54b   : > { %2074 = vmatpush1.bf16.msra.mxu0 %v4261_v8  ;;  %2105 = vmatprep.mubr.bf16.mxu0 %v4622_v45 }
 0x54c   : > { %2075 = vmatprep.subr.bf16.mxu0 %v4269_v48 }
 0x54f   : > { %2076 = vmatpush1.bf16.msra.mxu0 %v4267_v10 }
 0x550   : > { %2077 = vmatprep.subr.bf16.mxu0 %v4275_v11 }
 0x553   : > { %2078 = vmatpush1.bf16.msra.mxu0 %v4273_v12 }
 0x554   : > { %2079 = vmatprep.subr.bf16.mxu0 %v4281_v13 }
 0x557   : > { %2080 = vmatpush1.bf16.msra.mxu0 %v4279_v14 }
 0x558   : > { %2081 = vmatprep.subr.bf16.mxu0 %v4287_v15 }
 0x55b   : > { %2082 = vmatpush1.bf16.msra.mxu0 %v4285_v18 }
 0x55c   : > { %2083 = vmatprep.subr.bf16.mxu0 %v4293_v19 }
 0x55f   : > { %2084 = vmatpush1.bf16.msra.mxu0 %v4291_v20 }
 0x560   : > { %2085 = vmatprep.subr.bf16.mxu0 %v4299_v21 }
 0x563   : > { %2086 = vmatpush1.bf16.msra.mxu0 %v4297_v22 }
 0x564   : > { %2087 = vmatprep.subr.bf16.mxu0 %v4305_v24 }
 0x567   : > { %2088 = vmatpush1.bf16.msra.mxu0 %v4303_v25  ;;  %v4341_v25 = vld [vmem:[#allocation2 + $0x464] ss:$8 sps:$4 sm:$0xff]  }
 0x568   : > { %2389 = vmatprep.subr.bf16.mxu0 %v4338_v57  ;;  %v4389_v57 = vld [vmem:[%s5267_s3 + $0x254] ss:$8 sps:$4 sm:$0xff]  }
 0x60a   : > { %v1817_v29 = vpop.f32.mrf.mxu0 }
 0x60b   : > { %v1832_v31 = vadd.f32 %v3676_v28, %v1817_v29  ;;  %v4345_v28 = vld [vmem:[#allocation2 + $0x450] ss:$8 sps:$4 sm:$0xff]   ;;  %v4353_v29 = vld [vmem:[#allocation2 + $0x444] ss:$8 sps:$4 sm:$0xff]  }
 0x60c   : > { %v1819_v32 = vpop.f32.mrf.mxu0 }
 0x60d   : > { %v4976_v33 = vadd.f32 %v1832_v31, %v4914_v17  ;;  %v4978_v34 = vadd.f32 %v1819_v32, %v1397_v30  ;;  %v4314_v17 = vld [vmem:[%s5267_s3 + $0x1e4] ss:$8 sps:$4 sm:$0xff]   ;;  %v4351_v30 = vld [vmem:[#allocation2 + $0x440] ss:$8 sps:$4 sm:$0xff]   ;;  %v4359_v31 = vld [vmem:[#allocation2 + $0x434] ss:$8 sps:$4 sm:$0xff]  }
 0x60e   : > { %v1821_v35 = vpop.f32.mrf.mxu0  ;;  %v4357_v32 = vld [vmem:[#allocation2 + $0x430] ss:$8 sps:$4 sm:$0xff]  }
 0x60f   : > { %v1852_v36 = vpack.c.bf16 %v4976_v33, %v4976_v33  ;;  %v1853_v37 = vrot.slane %v4976_v33, 7  ;;  %v4365_v35 = vld [vmem:[#allocation2 + $0x424] ss:$8 sps:$4 sm:$0xff]  }
 0x610   : > { %v1822_v38 = vpop.f32.mrf.mxu0 }
 0x611   : > { %2106 = vmatmul.mubr.bf16.vlgmr.msra.gmra.mxu0 %v1852_v36  ;;  %v1871_v39 = vpack.c.bf16 %v1853_v37, %v1853_v37  ;;  %v4363_v36 = vld [vmem:[#allocation2 + $0x420] ss:$8 sps:$4 sm:$0xff]   ;;  %v4371_v37 = vld [vmem:[#allocation2 + $0x414] ss:$8 sps:$4 sm:$0xff]   ;;  %v4369_v38 = vld [vmem:[#allocation2 + $0x410] ss:$8 sps:$4 sm:$0xff]  }
 0x612   : > { %2421 = vmatprep.mubr.bf16.mxu0 %v4622_v45  ;;  %2390 = vmatpush1.bf16.msra.mxu0 %v4336_v56  ;;  %v4384_v56 = vld [vmem:[%s5267_s3 + $0x260] ss:$8 sps:$4 sm:$0xff]  }
 0x613   : > { %1985 = vmatmul.mubr.bf16.vlgmr.msra.gmra.mxu1 %v1871_v39  ;;  %2391 = vmatprep.subr.bf16.mxu0 %v4344_v59  ;;  %v4374_v39 = vld [vmem:[#allocation2 + $0x494] ss:$8 sps:$4 sm:$0xff]   ;;  %v4392_v59 = vld [vmem:[%s5267_s3 + $0x244] ss:$8 sps:$4 sm:$0xff]  }
 0x614   : > { %2252 = vmatprep.mubr.bf16.mxu1 %v4622_v45  ;;  %2221 = vmatpush1.bf16.msra.mxu1 %v4309_v16  ;;  %v4377_v16 = vld [vmem:[#allocation2 + $0x404] ss:$8 sps:$4 sm:$0xff]  }
 0x615   : > { %2222 = vmatprep.subr.bf16.mxu1 %v4314_v17  ;;  %v4375_v17 = vld [vmem:[#allocation2 + $0x400] ss:$8 sps:$4 sm:$0xff]  }
 0x616   : > { %2392 = vmatpush1.bf16.msra.mxu0 %v4342_v58  ;;  %v4387_v58 = vld [vmem:[%s5267_s3 + $0x250] ss:$8 sps:$4 sm:$0xff]  }
 0x617   : > { %2393 = vmatprep.subr.bf16.mxu0 %v4350_v61  ;;  %v4393_v61 = vld [vmem:[%s5267_s3 + $0x230] ss:$8 sps:$4 sm:$0xff]  }
 0x618   : > { %2223 = vmatpush1.bf16.msra.mxu1 %v4312_v40  ;;  %v4380_v40 = vld [vmem:[#allocation2 + $0x484] ss:$8 sps:$4 sm:$0xff]  }
 0x619   : > { %2224 = vmatprep.subr.bf16.mxu1 %v4317_v41  ;;  %v4378_v41 = vld [vmem:[#allocation2 + $0x480] ss:$8 sps:$4 sm:$0xff]  }
 0x61a   : > { %2394 = vmatpush1.bf16.msra.mxu0 %v4348_v60  ;;  %v4390_v60 = vld [vmem:[%s5267_s3 + $0x240] ss:$8 sps:$4 sm:$0xff]  }
 0x61b   : > { %2395 = vmatprep.subr.bf16.mxu0 %v4356_v63  ;;  %v4398_v63 = vld [vmem:[%s5267_s3 + $0x224] ss:$8 sps:$4 sm:$0xff]  }
 0x61c   : > { %2225 = vmatpush1.bf16.msra.mxu1 %v4315_v42  ;;  %v3743_v42 = vld [vmem:[%s5268_s4 + $0x3] ss:$0 sm:$0xff] }
 0x61d   : > { %2226 = vmatprep.subr.bf16.mxu1 %v4320_v43 }
 0x61e   : > { %2396 = vmatpush1.bf16.msra.mxu0 %v4354_v62  ;;  %v4395_v62 = vld [vmem:[%s5267_s3 + $0x234] ss:$8 sps:$4 sm:$0xff]  }
 0x61f   : > { %2397 = vmatprep.subr.bf16.mxu0 %v4362_v4  ;;  %v4401_v4 = vld [vmem:[%s5267_s3 + $0x214] ss:$8 sps:$4 sm:$0xff]  }
 0x620   : > { %2227 = vmatpush1.bf16.msra.mxu1 %v4318_v44 }
 0x621   : > { %2228 = vmatprep.subr.bf16.mxu1 %v4323_v47 }
 0x622   : > { %2398 = vmatpush1.bf16.msra.mxu0 %v4360_v1  ;;  %v4396_v1 = vld [vmem:[%s5267_s3 + $0x220] ss:$8 sps:$4 sm:$0xff]  }
 0x623   : > { %2399 = vmatprep.subr.bf16.mxu0 %v4368_v6  ;;  %v4404_v6 = vld [vmem:[%s5267_s3 + $0x204] ss:$8 sps:$4 sm:$0xff]  }
 0x624   : > { %2229 = vmatpush1.bf16.msra.mxu1 %v4321_v46 }
 0x625   : > { %2230 = vmatprep.subr.bf16.mxu1 %v4326_v49 }
 0x626   : > { %2400 = vmatpush1.bf16.msra.mxu0 %v4366_v5  ;;  %v4399_v5 = vld [vmem:[%s5267_s3 + $0x210] ss:$8 sps:$4 sm:$0xff]  }
 0x627   : > { %2401 = vmatprep.subr.bf16.mxu0 %v4374_v39  ;;  %v4405_v39 = vld [vmem:[#allocation2 + $0x570] ss:$8 sps:$4 sm:$0xff]  }
 0x628   : > { %2231 = vmatpush1.bf16.msra.mxu1 %v4324_v50 }
 0x629   : > { %2232 = vmatprep.subr.bf16.mxu1 %v4329_v51 }
 0x62a   : > { %2402 = vmatpush1.bf16.msra.mxu0 %v4372_v2 }
 0x62b   : > { %2403 = vmatprep.subr.bf16.mxu0 %v4380_v40  ;;  %v4419_v40 = vld [vmem:[#allocation2 + $0x554] ss:$8 sps:$4 sm:$0xff]  }
 0x62c   : > { %2233 = vmatpush1.bf16.msra.mxu1 %v4327_v52 }
 0x62d   : > { %2234 = vmatprep.subr.bf16.mxu1 %v4332_v53 }
 0x62e   : > { %2404 = vmatpush1.bf16.msra.mxu0 %v4378_v41  ;;  %v4417_v41 = vld [vmem:[#allocation2 + $0x550] ss:$8 sps:$4 sm:$0xff]  }
 0x630   : > { %2235 = vmatpush1.bf16.msra.mxu1 %v4330_v54 }
 0x631   : > { %2510 = vmatprep.subr.bf16.mxu1 %v4335_v55  ;;  %v4386_v55 = vld [vmem:[%s5267_s3 + $0x264] ss:$8 sps:$4 sm:$0xff]  }
 0x6d1   : > { %v2107_v7 = vpop.f32.mrf.mxu0 }
 0x6d3   : > { %v1986_v8 = vpop.f32.mrf.mxu1  ;;  %v2109_v9 = vpop.f32.mrf.mxu0 }
 0x6d4   : > { %v2108_v18 = vadd.f32 %v2107_v7, %v1986_v8  ;;  %v4402_v7 = vld [vmem:[%s5267_s3 + $0x200] ss:$8 sps:$4 sm:$0xff]   ;;  %v4407_v8 = vld [vmem:[#allocation2 + $0x574] ss:$8 sps:$4 sm:$0xff]  }
 0x6d5   : > { %v1988_v48 = vpop.f32.mrf.mxu1  ;;  %v2111_v10 = vpop.f32.mrf.mxu0 }
 0x6d6   : > { %v2110_v11 = vadd.f32 %v2109_v9, %v1988_v48  ;;  %v4408_v9 = vld [vmem:[#allocation2 + $0x5f0] ss:$8 sps:$4 sm:$0xff]   ;;  %v4410_v48 = vld [vmem:[#allocation2 + $0x5f4] ss:$8 sps:$4 sm:$0xff]   ;;  %v4414_v10 = vld [vmem:[#allocation2 + $0x5e0] ss:$8 sps:$4 sm:$0xff]  }
 0x6d7   : > { %v1990_v12 = vpop.f32.mrf.mxu1  ;;  %v2112_v13 = vpop.f32.mrf.mxu0 }
 0x6d8   : > { %v3709_v14 = vmul.f32 -1.442695, %v2110_v11  ;;  %v4416_v11 = vld [vmem:[#allocation2 + $0x5e4] ss:$8 sps:$4 sm:$0xff]   ;;  %v4420_v12 = vld [vmem:[#allocation2 + $0x5d0] ss:$8 sps:$4 sm:$0xff]  }
 0x6d9   : > { %v1991_v15 = vpop.f32.mrf.mxu1  ;;  %v4422_v13 = vld [vmem:[#allocation2 + $0x5d4] ss:$8 sps:$4 sm:$0xff]  }
 0x6da   : > { %4507 = vpow2.f32 %v3709_v14  ;;  %v4426_v14 = vld [vmem:[#allocation2 + $0x5c0] ss:$8 sps:$4 sm:$0xff]   ;;  %v4428_v15 = vld [vmem:[#allocation2 + $0x5c4] ss:$8 sps:$4 sm:$0xff]  }
 0x6db   : > { %4509 = vtanh.f32 %v2108_v18  ;;  %v4432_v18 = vld [vmem:[#allocation2 + $0x5b0] ss:$8 sps:$4 sm:$0xff]  }
 0x6e7   : > { %v4508_v19 = vpop.eup %4507 }
 0x6e8   : > { %v2118_v20 = vadd.f32 1.0, %v4508_v19  ;;  %v4510_v21 = vpop.eup %4509  ;;  %v4434_v19 = vld [vmem:[#allocation2 + $0x5b4] ss:$8 sps:$4 sm:$0xff]  }
 0x6ea   : > { %4511 = vrcp.f32 %v2118_v20  ;;  %v4438_v20 = vld [vmem:[#allocation2 + $0x5a0] ss:$8 sps:$4 sm:$0xff]  }
 0x6f7   : > { %v4512_v22 = vpop.eup %4511 }
 0x6f8   : > { %v2121_v23 = vmul.f32 %v4512_v22, %v4510_v21  ;;  %v4440_v21 = vld [vmem:[#allocation2 + $0x5a4] ss:$8 sps:$4 sm:$0xff]  }
 0x6fa   : > { %v2139_v24 = vpack.c.bf16 %v2121_v23, %v2121_v23 }
 0x6fc   : > { %2253 = vmatmul.mubr.bf16.vlgmr.msra.gmra.mxu1 %v2139_v24 }
 0x6fd   : > { %2511 = vmatpush1.bf16.msra.mxu1 %v4333_v3  ;;  %2542 = vmatprep.mubr.bf16.mxu1 %v4622_v45 }
 0x6fe   : > { %2512 = vmatprep.subr.bf16.mxu1 %v4341_v25 }
 0x701   : > { %2513 = vmatpush1.bf16.msra.mxu1 %v4339_v26 }
 0x702   : > { %2514 = vmatprep.subr.bf16.mxu1 %v4347_v27 }
 0x705   : > { %2515 = vmatpush1.bf16.msra.mxu1 %v4345_v28 }
 0x706   : > { %2516 = vmatprep.subr.bf16.mxu1 %v4353_v29 }
 0x709   : > { %2517 = vmatpush1.bf16.msra.mxu1 %v4351_v30 }
 0x70a   : > { %2518 = vmatprep.subr.bf16.mxu1 %v4359_v31 }
 0x70d   : > { %2519 = vmatpush1.bf16.msra.mxu1 %v4357_v32 }
 0x70e   : > { %2520 = vmatprep.subr.bf16.mxu1 %v4365_v35 }
 0x711   : > { %2521 = vmatpush1.bf16.msra.mxu1 %v4363_v36 }
 0x712   : > { %2522 = vmatprep.subr.bf16.mxu1 %v4371_v37 }
 0x715   : > { %2523 = vmatpush1.bf16.msra.mxu1 %v4369_v38 }
 0x716   : > { %2524 = vmatprep.subr.bf16.mxu1 %v4377_v16  ;;  %v4413_v16 = vld [vmem:[#allocation2 + $0x564] ss:$8 sps:$4 sm:$0xff]  }
 0x719   : > { %2525 = vmatpush1.bf16.msra.mxu1 %v4375_v17  ;;  %v4411_v17 = vld [vmem:[#allocation2 + $0x560] ss:$8 sps:$4 sm:$0xff]  }
 0x71a   : > { %2826 = vmatprep.subr.bf16.mxu1 %v4410_v48  ;;  %v4459_v48 = vld [vmem:[%s5267_s3 + $0x2d0] ss:$8 sps:$4 sm:$0xff]  }
 0x7bc   : > { %v2254_v43 = vpop.f32.mrf.mxu1 }
 0x7bd   : > { %v2269_v44 = vadd.f32 %v3743_v42, %v2254_v43  ;;  %v4425_v42 = vld [vmem:[#allocation2 + $0x544] ss:$8 sps:$4 sm:$0xff]   ;;  %v4423_v43 = vld [vmem:[#allocation2 + $0x540] ss:$8 sps:$4 sm:$0xff]  }
 0x7be   : > { %v2256_v46 = vpop.f32.mrf.mxu1 }
 0x7bf   : > { %v5038_v47 = vadd.f32 %v2269_v44, %v4976_v33  ;;  %v5041_v49 = vadd.f32 %v2256_v46, %v4978_v34  ;;  %v4383_v33 = vld [vmem:[%s5267_s3 + $0x274] ss:$8 sps:$4 sm:$0xff]   ;;  %v4381_v34 = vld [vmem:[%s5267_s3 + $0x270] ss:$8 sps:$4 sm:$0xff]  }
 0x7c0   : > { %v2258_v50 = vpop.f32.mrf.mxu1  ;;  %2657 = vmatprep.subr.bf16.mxu0 %v4383_v33  ;;  %v4431_v44 = vld [vmem:[#allocation2 + $0x534] ss:$8 sps:$4 sm:$0xff]   ;;  %v4429_v46 = vld [vmem:[#allocation2 + $0x530] ss:$8 sps:$4 sm:$0xff]  }
 0x7c1   : > { %v2289_v51 = vpack.c.bf16 %v5038_v47, %v5038_v47  ;;  %v2290_v52 = vrot.slane %v5038_v47, 7  ;;  %v4437_v50 = vld [vmem:[#allocation2 + $0x524] ss:$8 sps:$4 sm:$0xff]   ;;  %v4444_v33 = vld [vmem:[#allocation2 + $0x590] ss:$8 sps:$4 sm:$0xff]  }
 0x7c2   : > { %v2259_v53 = vpop.f32.mrf.mxu1 }
 0x7c3   : > { %2543 = vmatmul.mubr.bf16.vlgmr.msra.gmra.mxu1 %v2289_v51  ;;  %v2308_v54 = vpack.c.bf16 %v2290_v52, %v2290_v52  ;;  %v4435_v51 = vld [vmem:[#allocation2 + $0x520] ss:$8 sps:$4 sm:$0xff]   ;;  %v4443_v52 = vld [vmem:[#allocation2 + $0x514] ss:$8 sps:$4 sm:$0xff]   ;;  %v4441_v53 = vld [vmem:[#allocation2 + $0x510] ss:$8 sps:$4 sm:$0xff]  }
 0x7c4   : > { %2858 = vmatprep.mubr.bf16.mxu1 %v4622_v45  ;;  %2827 = vmatpush1.bf16.msra.mxu1 %v4408_v9  ;;  %v4456_v9 = vld [vmem:[%s5267_s3 + $0x2e0] ss:$8 sps:$4 sm:$0xff]  }
 0x7c5   : > { %2422 = vmatmul.mubr.bf16.vlgmr.msra.gmra.mxu0 %v2308_v54  ;;  %2828 = vmatprep.subr.bf16.mxu1 %v4416_v11  ;;  %v4446_v54 = vld [vmem:[#allocation2 + $0x594] ss:$8 sps:$4 sm:$0xff]   ;;  %v4462_v11 = vld [vmem:[%s5267_s3 + $0x2c0] ss:$8 sps:$4 sm:$0xff]  }
 0x7c6   : > { %2689 = vmatprep.mubr.bf16.mxu0 %v4622_v45  ;;  %2658 = vmatpush1.bf16.msra.mxu0 %v4381_v34  ;;  %v4449_v34 = vld [vmem:[#allocation2 + $0x504] ss:$8 sps:$4 sm:$0xff]  }
 0x7c7   : > { %2659 = vmatprep.subr.bf16.mxu0 %v4386_v55  ;;  %v4447_v55 = vld [vmem:[#allocation2 + $0x500] ss:$8 sps:$4 sm:$0xff]  }
 0x7c8   : > { %2829 = vmatpush1.bf16.msra.mxu1 %v4414_v10  ;;  %v4464_v10 = vld [vmem:[%s5267_s3 + $0x2c4] ss:$8 sps:$4 sm:$0xff]  }
 0x7c9   : > { %2830 = vmatprep.subr.bf16.mxu1 %v4422_v13  ;;  %v4467_v13 = vld [vmem:[%s5267_s3 + $0x2b4] ss:$8 sps:$4 sm:$0xff]  }
 0x7ca   : > { %2660 = vmatpush1.bf16.msra.mxu0 %v4384_v56  ;;  %v4452_v56 = vld [vmem:[#allocation2 + $0x584] ss:$8 sps:$4 sm:$0xff]  }
 0x7cb   : > { %2661 = vmatprep.subr.bf16.mxu0 %v4389_v57  ;;  %v4450_v57 = vld [vmem:[#allocation2 + $0x580] ss:$8 sps:$4 sm:$0xff]  }
 0x7cc   : > { %2831 = vmatpush1.bf16.msra.mxu1 %v4420_v12  ;;  %v4465_v12 = vld [vmem:[%s5267_s3 + $0x2b0] ss:$8 sps:$4 sm:$0xff]  }
 0x7cd   : > { %2832 = vmatprep.subr.bf16.mxu1 %v4428_v15  ;;  %v4468_v15 = vld [vmem:[%s5267_s3 + $0x2a0] ss:$8 sps:$4 sm:$0xff]  }
 0x7ce   : > { %2662 = vmatpush1.bf16.msra.mxu0 %v4387_v58  ;;  %v3810_v58 = vld [vmem:[%s5268_s4 + $0x4] ss:$0 sm:$0xff] }
 0x7cf   : > { %2663 = vmatprep.subr.bf16.mxu0 %v4392_v59 }
 0x7d0   : > { %2833 = vmatpush1.bf16.msra.mxu1 %v4426_v14  ;;  %v4470_v14 = vld [vmem:[%s5267_s3 + $0x2a4] ss:$8 sps:$4 sm:$0xff]  }
 0x7d1   : > { %2834 = vmatprep.subr.bf16.mxu1 %v4434_v19  ;;  %v4471_v19 = vld [vmem:[%s5267_s3 + $0x290] ss:$8 sps:$4 sm:$0xff]  }
 0x7d2   : > { %2664 = vmatpush1.bf16.msra.mxu0 %v4390_v60 }
 0x7d3   : > { %2665 = vmatprep.subr.bf16.mxu0 %v4395_v62 }
 0x7d4   : > { %2835 = vmatpush1.bf16.msra.mxu1 %v4432_v18  ;;  %v4473_v18 = vld [vmem:[%s5267_s3 + $0x294] ss:$8 sps:$4 sm:$0xff]  }
 0x7d5   : > { %2836 = vmatprep.subr.bf16.mxu1 %v4440_v21  ;;  %v4474_v21 = vld [vmem:[%s5267_s3 + $0x280] ss:$8 sps:$4 sm:$0xff]  }
 0x7d6   : > { %2666 = vmatpush1.bf16.msra.mxu0 %v4393_v61 }
 0x7d7   : > { %2667 = vmatprep.subr.bf16.mxu0 %v4398_v63 }
 0x7d8   : > { %2837 = vmatpush1.bf16.msra.mxu1 %v4438_v20  ;;  %v4476_v20 = vld [vmem:[%s5267_s3 + $0x284] ss:$8 sps:$4 sm:$0xff]  }
 0x7d9   : > { %2838 = vmatprep.subr.bf16.mxu1 %v4446_v54 }
 0x7da   : > { %2668 = vmatpush1.bf16.msra.mxu0 %v4396_v1 }
 0x7db   : > { %2669 = vmatprep.subr.bf16.mxu0 %v4401_v4 }
 0x7dc   : > { %2839 = vmatpush1.bf16.msra.mxu1 %v4444_v33  ;;  %v4481_v33 = vld [vmem:[%s5272_s8 + $0x18] sm:$0xff]  }
 0x7dd   : > { %2840 = vmatprep.subr.bf16.mxu1 %v4452_v56  ;;  %v4485_v56 = vld [vmem:[%s5272_s8 + $0x8] sm:$0xff]  }
 0x7de   : > { %2670 = vmatpush1.bf16.msra.mxu0 %v4399_v5 }
 0x7df   : > { %2671 = vmatprep.subr.bf16.mxu0 %v4404_v6 }
 0x7e0   : > { %2841 = vmatpush1.bf16.msra.mxu1 %v4450_v57  ;;  %v4486_v57 = vld [vmem:[%s5273_s9 + $0x8] sm:$0xff]  }
 0x7e2   : > { %2672 = vmatpush1.bf16.msra.mxu0 %v4402_v7 }
 0x7e3   : > { %2947 = vmatprep.subr.bf16.mxu0 %v4407_v8  ;;  %v4455_v8 = vld [vmem:[%s5267_s3 + $0x2f4] ss:$8 sps:$4 sm:$0xff]  }
 0x7e4   : > { %3094 = vmatprep.subr.bf16.mxu1 %v4455_v8 }
 0x883   : > { %v2544_v22 = vpop.f32.mrf.mxu1 }
 0x885   : > { %v2423_v23 = vpop.f32.mrf.mxu0  ;;  %v2546_v3 = vpop.f32.mrf.mxu1 }
 0x886   : > { %v2545_v31 = vadd.f32 %v2544_v22, %v2423_v23  ;;  %v4477_v22 = vld [vmem:[%s5270_s6 + $0x18] sm:$0xff]  }
 0x887   : > { %v2425_v24 = vpop.f32.mrf.mxu0  ;;  %v2548_v25 = vpop.f32.mrf.mxu1 }
 0x888   : > { %v2547_v26 = vadd.f32 %v2546_v3, %v2425_v24 }
 0x889   : > { %v2427_v27 = vpop.f32.mrf.mxu0  ;;  %v2549_v28 = vpop.f32.mrf.mxu1 }
 0x88a   : > { %v3776_v29 = vmul.f32 -1.442695, %v2547_v26 }
 0x88b   : > { %v2428_v30 = vpop.f32.mrf.mxu0 }
 0x88c   : > { %4513 = vpow2.f32 %v3776_v29 }
 0x88d   : > { %4515 = vtanh.f32 %v2545_v31 }
 0x899   : > { %v4514_v32 = vpop.eup %4513 }
 0x89a   : > { %v2555_v35 = vadd.f32 1.0, %v4514_v32  ;;  %v4516_v36 = vpop.eup %4515 }
 0x89c   : > { %4517 = vrcp.f32 %v2555_v35 }
 0x8a9   : > { %v4518_v37 = vpop.eup %4517 }
 0x8aa   : > { %v2558_v38 = vmul.f32 %v4518_v37, %v4516_v36 }
 0x8ac   : > { %v2576_v2 = vpack.c.bf16 %v2558_v38, %v2558_v38 }
 0x8ae   : > { %2690 = vmatmul.mubr.bf16.vlgmr.msra.gmra.mxu0 %v2576_v2 }
 0x8af   : > { %2948 = vmatpush1.bf16.msra.mxu0 %v4405_v39  ;;  %2979 = vmatprep.mubr.bf16.mxu0 %v4622_v45 }
 0x8b0   : > { %2949 = vmatprep.subr.bf16.mxu0 %v4413_v16  ;;  %v4478_v16 = vld [vmem:[%s5270_s6 + $0x10] sm:$0xff]  }
 0x8b3   : > { %2950 = vmatpush1.bf16.msra.mxu0 %v4411_v17  ;;  %v4479_v17 = vld [vmem:[%s5270_s6 + $0x8] sm:$0xff]  }
 0x8b4   : > { %2951 = vmatprep.subr.bf16.mxu0 %v4419_v40  ;;  %v4480_v40 = vld [vmem:[%s5270_s6] sm:$0xff]  }
 0x8b7   : > { %2952 = vmatpush1.bf16.msra.mxu0 %v4417_v41  ;;  %v4482_v41 = vld [vmem:[%s5273_s9 + $0x18] sm:$0xff]  }
 0x8b8   : > { %2953 = vmatprep.subr.bf16.mxu0 %v4425_v42  ;;  %v4484_v42 = vld [vmem:[%s5273_s9 + $0x10] sm:$0xff]  }
 0x8bb   : > { %2954 = vmatpush1.bf16.msra.mxu0 %v4423_v43 }
 0x8bc   : > { %2955 = vmatprep.subr.bf16.mxu0 %v4431_v44 }
 0x8bf   : > { %2956 = vmatpush1.bf16.msra.mxu0 %v4429_v46  ;;  %v3876_v46 = vld [vmem:[%s5269_s5] ss:$0 sm:$0xff] }
 0x8c0   : > { %2957 = vmatprep.subr.bf16.mxu0 %v4437_v50 }
 0x8c3   : > { %2958 = vmatpush1.bf16.msra.mxu0 %v4435_v51 }
 0x8c4   : > { %2959 = vmatprep.subr.bf16.mxu0 %v4443_v52 }
 0x8c7   : > { %2960 = vmatpush1.bf16.msra.mxu0 %v4441_v53 }
 0x8c8   : > { %2961 = vmatprep.subr.bf16.mxu0 %v4449_v34 }
 0x8cb   : > { %2962 = vmatpush1.bf16.msra.mxu0 %v4447_v55  ;;  %v4483_v55 = vld [vmem:[%s5272_s8 + $0x10] sm:$0xff]  }
 0x8cc   : > { %3946 = vmatprep.subr.bf16.mxu0 %v4620_v0 }
 0x96e   : > { %v2691_v59 = vpop.f32.mrf.mxu0 }
 0x96f   : > { %v2706_v60 = vadd.f32 %v3810_v58, %v2691_v59  ;;  %v4487_v58 = vld [vmem:[%s5272_s8] sm:$0xff]  }
 0x970   : > { %v2693_v61 = vpop.f32.mrf.mxu0  ;;  %v4488_v59 = vld [vmem:[%s5273_s9] sm:$0xff]  }
 0x971   : > { %v2707_v62 = vadd.f32 %v2706_v60, %v5038_v47  ;;  %v5103_v63 = vadd.f32 %v2693_v61, %v5041_v49  ;;  %v4453_v47 = vld [vmem:[%s5267_s3 + $0x2f0] ss:$8 sps:$4 sm:$0xff]   ;;  %v4458_v49 = vld [vmem:[%s5267_s3 + $0x2e4] ss:$8 sps:$4 sm:$0xff]   ;;  %v3877_v60 = vld [vmem:[%s5271_s7] ss:$0 sm:$0xff] }
 0x972   : > { %v2695_v1 = vpop.f32.mrf.mxu0 }
 0x973   : > { %v2726_v4 = vpack.c.bf16 %v2707_v62, %v2707_v62  ;;  %v2727_v5 = vrot.slane %v2707_v62, 7 }
 0x974   : > { %v2696_v6 = vpop.f32.mrf.mxu0 }
 0x975   : > { %v2745_v7 = vpack.c.bf16 %v2727_v5, %v2727_v5  ;;  %2980 = vmatmul.mubr.bf16.vlgmr.msra.gmra.mxu0 %v2726_v4 }
 0x976   : > { %3954 = vmatprep.mubr.msk.bf16.mxu0 %vm4621_vm0, %v4620_v0  ;;  %3947 = vmatpush3.bf16.msra.mxu0 %v4477_v22 }
 0x977   : > { %2859 = vmatmul.mubr.bf16.vlgmr.msra.gmra.mxu1 %v2745_v7  ;;  %3948 = vmatprep.subr.bf16.mxu0 %v4620_v0 }
 0x978   : > { %3126 = vmatprep.mubr.bf16.mxu1 %v4622_v45  ;;  %3095 = vmatpush1.bf16.msra.mxu1 %v4453_v47  ;;  %v4461_v45 = vld [vmem:[%s5267_s3 + $0x2d4] ss:$8 sps:$4 sm:$0xff]  }
 0x979   : > { %3096 = vmatprep.subr.bf16.mxu1 %v4458_v49 }
 0x97a   : > { %3949 = vmatpush3.bf16.msra.mxu0 %v4478_v16 }
 0x97b   : > { %3950 = vmatprep.subr.bf16.mxu0 %v4620_v0 }
 0x97c   : > { %3097 = vmatpush1.bf16.msra.mxu1 %v4456_v9 }
 0x97d   : > { %3098 = vmatprep.subr.bf16.mxu1 %v4461_v45 }
 0x97e   : > { %3951 = vmatpush3.bf16.msra.mxu0 %v4479_v17 }
 0x97f   : > { %3952 = vmatprep.subr.bf16.mxu0 %v4620_v0 }
 0x980   : > { %3099 = vmatpush1.bf16.msra.mxu1 %v4459_v48 }
 0x981   : > { %3100 = vmatprep.subr.bf16.mxu1 %v4464_v10 }
 0x982   : > { %3953 = vmatpush3.bf16.msra.mxu0 %v4480_v40 }
 0x983   : > { %3970 = vmatprep.subr.bf16.mxu0 %v4620_v0 }
 0x984   : > { %3101 = vmatpush1.bf16.msra.mxu1 %v4462_v11 }
 0x985   : > { %3102 = vmatprep.subr.bf16.mxu1 %v4467_v13 }
 0x988   : > { %3103 = vmatpush1.bf16.msra.mxu1 %v4465_v12 }
 0x989   : > { %3104 = vmatprep.subr.bf16.mxu1 %v4470_v14 }
 0x98c   : > { %3105 = vmatpush1.bf16.msra.mxu1 %v4468_v15 }
 0x98d   : > { %3106 = vmatprep.subr.bf16.mxu1 %v4473_v18 }
 0x990   : > { %3107 = vmatpush1.bf16.msra.mxu1 %v4471_v19 }
 0x991   : > { %3108 = vmatprep.subr.bf16.mxu1 %v4476_v20 }
 0x994   : > { %3109 = vmatpush1.bf16.msra.mxu1 %v4474_v21 }
 0x995   : > { %3958 = vmatprep.subr.bf16.mxu1 %v4620_v0 }
 0xa35   : > { %v2981_v23 = vpop.f32.mrf.mxu0 }
 0xa37   : > { %v2860_v3 = vpop.f32.mrf.mxu1  ;;  %v2983_v24 = vpop.f32.mrf.mxu0 }
 0xa38   : > { %v2982_v32 = vadd.f32 %v2981_v23, %v2860_v3 }
 0xa39   : > { %v2862_v25 = vpop.f32.mrf.mxu1  ;;  %v2985_v26 = vpop.f32.mrf.mxu0 }
 0xa3a   : > { %v2984_v27 = vadd.f32 %v2983_v24, %v2862_v25 }
 0xa3b   : > { %v2864_v28 = vpop.f32.mrf.mxu1  ;;  %v2986_v29 = vpop.f32.mrf.mxu0 }
 0xa3c   : > { %v3843_v30 = vmul.f32 -1.442695, %v2984_v27 }
 0xa3d   : > { %v2865_v31 = vpop.f32.mrf.mxu1 }
 0xa3e   : > { %4519 = vpow2.f32 %v3843_v30 }
 0xa3f   : > { %4521 = vtanh.f32 %v2982_v32 }
 0xa4b   : > { %v4520_v35 = vpop.eup %4519 }
 0xa4c   : > { %v2992_v36 = vadd.f32 1.0, %v4520_v35  ;;  %v4522_v37 = vpop.eup %4521 }
 0xa4e   : > { %4523 = vrcp.f32 %v2992_v36 }
 0xa5b   : > { %v4524_v38 = vpop.eup %4523 }
 0xa5c   : > { %v2995_v39 = vmul.f32 %v4524_v38, %v4522_v37 }
 0xa5e   : > { %v3013_v2 = vpack.c.bf16 %v2995_v39, %v2995_v39 }
 0xa60   : > { %3127 = vmatmul.mubr.bf16.vlgmr.msra.gmra.mxu1 %v3013_v2 }
 0xa61   : > { %3966 = vmatprep.mubr.msk.bf16.mxu1 %vm4621_vm0, %v4620_v0  ;;  %3959 = vmatpush3.bf16.msra.mxu1 %v4482_v41 }
 0xa62   : > { %3960 = vmatprep.subr.bf16.mxu1 %v4620_v0 }
 0xa65   : > { %3961 = vmatpush3.bf16.msra.mxu1 %v4484_v42 }
 0xa66   : > { %3962 = vmatprep.subr.bf16.mxu1 %v4620_v0 }
 0xa69   : > { %3963 = vmatpush3.bf16.msra.mxu1 %v4486_v57 }
 0xa6a   : > { %3964 = vmatprep.subr.bf16.mxu1 %v4620_v0 }
 0xa6d   : > { %3965 = vmatpush3.bf16.msra.mxu1 %v4488_v59 }
 0xb20   : > { %v3128_v43 = vpop.f32.mrf.mxu1 }
 0xb22   : > { %v3129_v44 = vpop.f32.mrf.mxu1 }
 0xb23   : > { %v3134_v50 = vadd.f32 %v3129_v44, %v5103_v63 }
 0xb24   : > { %v3131_v51 = vpop.f32.mrf.mxu1 }
 0xb25   : > { %v3142_v52 = vadd.f32 %v3876_v46, %v3134_v50 }
 0xb26   : > { %v3132_v53 = vpop.f32.mrf.mxu1 }
 0xb27   : > { %v3143_v54 = vmax.f32 %v3142_v52, 0.0 }
 0xb29   : > { %v3152_v34 = vpack.c.bf16 %v3143_v54, %v3143_v54 }
 0xb2b   : > { %3955 = vmatmul.mubr.msk.bf16.vlgmr.msra.gmra.mxu0 %vm416_vm1, %v3152_v34 }
 0xb2c   : > { %3971 = vmatpush3.bf16.msra.mxu0 %v4481_v33  ;;  %3978 = vmatprep.mubr.msk.bf16.mxu0 %vm4621_vm0, %v4620_v0 }
 0xb2d   : > { %3972 = vmatprep.subr.bf16.mxu0 %v4620_v0 }
 0xb30   : > { %3973 = vmatpush3.bf16.msra.mxu0 %v4483_v55 }
 0xb31   : > { %3974 = vmatprep.subr.bf16.mxu0 %v4620_v0 }
 0xb34   : > { %3975 = vmatpush3.bf16.msra.mxu0 %v4485_v56 }
 0xb35   : > { %3976 = vmatprep.subr.bf16.mxu0 %v4620_v0 }
 0xb38   : > { %3977 = vmatpush3.bf16.msra.mxu0 %v4487_v58 }
 0xbeb   : > { %v3221_v61 = vpop.f32.mrf.mxu0 }
 0xbec   : > { %v3222_v62 = vadd.f32 %v3877_v60, %v3221_v61 }
 0xbed   : > { %v3956_v63 = vpop.f32.mrf.mxu0 }
 0xbee   : > { %v3227_v1 = vmax.f32 %v3222_v62, 0.0 }
 0xbef   : > { %v3224_v4 = vpop.f32.mrf.mxu0 }
 0xbf0   : > { %v3236_v5 = vpack.c.bf16 %v3227_v1, %v3227_v1  ;;  %v3237_v6 = vrot.slane %v3227_v1, 1 }
 0xbf1   : > { %v3957_v0 = vpop.f32.mrf.mxu0 }
 0xbf2   : > { %v3246_v7 = vpack.c.bf16 %v3237_v6, %v3237_v6  ;;  %3979 = vmatmul.mubr.msk.bf16.vlgmr.msra.gmra.mxu0 %vm416_vm1, %v3236_v5 }
 0xbf4   : > { %3967 = vmatmul.mubr.msk.bf16.vlgmr.msra.gmra.mxu1 %vm416_vm1, %v3246_v7 }
 0xcb2   : > { %v3375_v8 = vpop.f32.mrf.mxu0 }
 0xcb4   : > { %v3308_v47 = vpop.f32.mrf.mxu1  ;;  %v3980_v49 = vpop.f32.mrf.mxu0 }
 0xcb5   : > { %v3376_v9 = vadd.f32 %v3375_v8, %v3308_v47 }
 0xcb6   : > { %v3968_v45 = vpop.f32.mrf.mxu1  ;;  %v3378_v48 = vpop.f32.mrf.mxu0 }
 0xcb7   : > { %3381 = vst.msk [vmem:[%s365_s21] sm:$0xff] %vm416_vm1, %v3376_v9 }
 0xcb8   : > { %v3311_v10 = vpop.f32.mrf.mxu1  ;;  %v3981_v11 = vpop.f32.mrf.mxu0 }
 0xcb9   : > { %4564 = shalt.err (!%p4561_p0)
}
 0xcba   : > { %s4565_s20 = scalar_lea.hbm %s5222_s27, 128  ;;  %s4569_s26 = scalar_lea.hbm %s5274_s10, 256 }
 0xcbb   : > { %p4566_p1 = scmp.ne.s32.totalorder %s5222_s27, %s4565_s20  ;;  %p4570_p4 = scmp.lt.s32.totalorder %s5222_s27, %s5274_s10 }
 0xcbc   : > { %p4571_p7 = scmp.lt.s32.totalorder %s4569_s26, %s4565_s20 }
 0xcbd   : > { %p4567_p2 = pnand %p4566_p1, %p4717_p5 }
 0xcbe   : > { %p4572_p6 = por %p4571_p7, %p4570_p4 }
 0xcbf   : > { %p4568_p3 = pneg %p4567_p2 }
 0xcc1   : > { %p4573_p8 = pnand %p4572_p6, %p4568_p3 }
 0xcc3   : > { %4576 = shalt.err (!%p4573_p8)
}
 0xcc4   : > { %3986 = dma.vmem_to_hbm [thread:$0]  (%p4717_p5), %s5224_s25, 128, %s5222_s27, %s3383_s17   ;;  %v3969_v12 = vpop.f32.mrf.mxu1 }
 0xcc5 PF: > { %p3998_p9 = scmp.ge.s32.totalorder %s4615_s16, 2  ;;  %s3408_s28 = sand.u32 1, %s4603_s13  }
 0xcc6   : > { %p5278_p10 = scmp.ne.s32.totalorder %s5276_s24, 0  ;;  %s3409_s29 = scalar_lea.sflag [#allocation4], %s3408_s28 }
 0xcc8   : > { %p3993_p11 = pnand %p3998_p9, %p5278_p10 }
 0xcca   : > { %p3994_p12 = pneg %p3993_p11 }
 0xccc   : > { %4598 = dma.done.wait (%p3994_p12), %s3409_s29, 128  }
 0xccd   : > { %4600 = vsyncadd (%p3994_p12), %s3409_s29, 4294967168  ;;  %p21_p13 = scmp.ge.s32.totalorder %s4704_s19, 4   ;;  %s5279_s13 = smov %s4607_s14 }
 0xcce   : > { %s5280_s14 = smov %s4611_s15  ;;  %s5281_s15 = smov %s4715_s22 }
 0xccf   : > { %s5282_s16 = smov %s4704_s19  ;;  %23 = sbr.rel (!%p21_p13) target bundleno = 4 (0x4), region = 121 }
 0xcd4   :  { %3414 = vsyncpa [#allocation3], 1 }
 0xcd5   :  { %3416 = vsyncpa [#allocation3 + $0x1], 1 }
 0xcd6   :  { %3417 = vsyncpa [#allocation4], 1 }
 0xcd7   :  { %3419 = vsyncpa [#allocation4 + $0x1], 1 }

</bundles_post_ra>
